<compile_context>
chip_gen: v7x
topology: tpu7x:2x2x1
jax: 0.10.0
libtpu: 0.0.40
codegen_flags: <defaults>
</compile_context>

<pallas_src>
import functools

import jax
import jax.numpy as jnp
from jax.experimental import pallas as pl
from jax.experimental.pallas import tpu as pltpu


def _conv_block_kernel(xpad_ref, w_ref, b_ref, out_ref, *,
                       kh, kw, dil, hout, wout, matmul_dtype):
    # xpad_ref: (bt, Hp, Wp, Cin) zero-padded NHWC input tile
    # w_ref:    (kh*kw, Cin, Cout) per-tap weight matrices
    # b_ref:    (1, Cout) bias row
    # out_ref:  (bt, Hout, Wout, Cout)
    bt = xpad_ref.shape[0]
    cin = xpad_ref.shape[3]
    cout = w_ref.shape[2]
    m = bt * hout * wout

    # Hoisted once per grid step: weights (optionally cast to bf16) and the bias
    # broadcast folded directly into the accumulator init.
    w_all = w_ref[...].astype(matmul_dtype)                       # (kh*kw, Cin, Cout)
    acc = jnp.broadcast_to(b_ref[...], (m, cout))                 # f32 accumulator

    # kh x kw "same" conv as kh*kw shifted (M, Cin) @ (Cin, Cout) MXU matmuls
    # accumulating in f32; the whole batch tile is flattened into M.
    for k in range(kh * kw):
        ki, kj = divmod(k, kw)
        di, dj = ki * dil, kj * dil
        tap = xpad_ref[:, di:di + hout, dj:dj + wout, :]          # (bt, Hout, Wout, Cin)
        tap = tap.reshape(m, cin).astype(matmul_dtype)
        acc = acc + jnp.dot(tap, w_all[k],
                            preferred_element_type=jnp.float32)

    y = jnp.maximum(acc, 0.0)                                     # ReLU fused on the VPU
    out_ref[...] = y.reshape(bt, hout, wout, cout).astype(out_ref.dtype)


def conv_block_pallas(x, weight, bias, *, stride=1, padding=1, dilation=1,
                      use_bf16_matmul=False):
    """ConvBlock forward: ReLU(Conv2d(x, weight, bias)).

    x:      (B, Cin, H, W)  NCHW (PyTorch convention)
    weight: (Cout, Cin, KH, KW) OIHW (PyTorch convention)
    bias:   (Cout,)
    Returns (B, Cout, Hout, Wout), NCHW, float32.
    """
    if stride != 1:
        # TODO(synk): stride > 1 not implemented in the Pallas kernel (the mpe.py
        # ConvBlocks use stride=1); it would need strided patch slices.
        raise NotImplementedError("stride > 1 not supported by this kernel")

    B, Cin, H, W = x.shape
    Cout, _, KH, KW = weight.shape
    Hout = H + 2 * padding - dilation * (KH - 1)
    Wout = W + 2 * padding - dilation * (KW - 1)
    assert Hout > 0 and Wout > 0
    Hp, Wp = H + 2 * padding, W + 2 * padding

    # NCHW -> NHWC + spatial zero pad in XLA (one pass; channels stay on lanes
    # inside the kernel).
    xpad = jnp.pad(jnp.transpose(x, (0, 2, 3, 1)).astype(jnp.float32),
                   ((0, 0), (padding, padding), (padding, padding), (0, 0)))
    # OIHW -> (KH*KW, Cin, Cout) per-tap matrices.
    w_taps = jnp.transpose(weight, (2, 3, 1, 0)).reshape(KH * KW, Cin, Cout)
    w_taps = w_taps.astype(jnp.float32)
    b_row = bias.reshape(1, Cout).astype(jnp.float32)

    # Process the whole batch in one grid step when it comfortably fits VMEM
    # (avoids tiny-grid pipeline overhead); otherwise tile the batch and let the
    # "parallel" axis be split across v7x's two TensorCores.
    batch_bytes = B * (Hp * Wp * Cin + Hout * Wout * Cout) * 4
    bt = B if batch_bytes <= (8 << 20) else 1
    while B % bt:
        bt -= 1
    grid = (B // bt,)

    matmul_dtype = jnp.bfloat16 if use_bf16_matmul else jnp.float32
    kernel = functools.partial(_conv_block_kernel, kh=KH, kw=KW, dil=dilation,
                               hout=Hout, wout=Wout, matmul_dtype=matmul_dtype)

    out_nhwc = pl.pallas_call(
        kernel,
        out_shape=jax.ShapeDtypeStruct((B, Hout, Wout, Cout), jnp.float32),
        grid=grid,
        in_specs=[
            pl.BlockSpec((bt, Hp, Wp, Cin), lambda g: (g, 0, 0, 0)),
            pl.BlockSpec((KH * KW, Cin, Cout), lambda g: (0, 0, 0)),
            pl.BlockSpec((1, Cout), lambda g: (0, 0)),
        ],
        out_specs=pl.BlockSpec((bt, Hout, Wout, Cout), lambda g: (g, 0, 0, 0)),
        compiler_params=pltpu.CompilerParams(
            dimension_semantics=("parallel",)),
    )(xpad, w_taps, b_row)

    return jnp.transpose(out_nhwc, (0, 3, 1, 2))


# ---------------- pure-JAX reference (mirrors the PyTorch module) ----------------
def conv_block_ref(x, weight, bias, *, stride=1, padding=1, dilation=1):
    y = jax.lax.conv_general_dilated(
        x.astype(jnp.float32), weight.astype(jnp.float32),
        window_strides=(stride, stride),
        padding=((padding, padding), (padding, padding)),
        rhs_dilation=(dilation, dilation),
        dimension_numbers=('NCHW', 'OIHW', 'NCHW'))
    y = y + bias[None, :, None, None]
    return jnp.maximum(y, 0.0)


if __name__ == "__main__":
    # Small shapes consistent with the module: ConvBlock(4, 32, 3, 1, 1).
    B, Cin, Cout, H, W, K = 2, 4, 32, 16, 16, 3

    key = jax.random.PRNGKey(0)
    kx, kw_, kb = jax.random.split(key, 3)
    x = jax.random.normal(kx, (B, Cin, H, W), jnp.float32)
    weight = jax.random.normal(kw_, (Cout, Cin, K, K), jnp.float32) * 0.1
    bias = jax.random.normal(kb, (Cout,), jnp.float32) * 0.1

    out = conv_block_pallas(x, weight, bias, stride=1, padding=1, dilation=1)
    out = jax.block_until_ready(out)

    ref = conv_block_ref(x, weight, bias, stride=1, padding=1, dilation=1)
    assert out.shape == (B, Cout, H, W), out.shape
    err = float(jnp.max(jnp.abs(out - ref)))
    assert err < 1e-4, f"max abs err {err}"
    print("KERNEL_OK")
</pallas_src>

<mosaic_0001>
module attributes {stable_mosaic.version = 11 : i64} {
  func.func @_conv_block_kernel(%arg0: i32, %arg1: memref<2x18x18x4xf32, #tpu.memory_space<vmem>>, %arg2: memref<9x4x32xf32, #tpu.memory_space<vmem>>, %arg3: memref<1x32xf32, #tpu.memory_space<vmem>>, %arg4: memref<2x16x16x32xf32, #tpu.memory_space<vmem>>) attributes {dimension_semantics = [#tpu.dimension_semantics<parallel>], iteration_bounds = array<i64: 1>, scalar_prefetch = 0 : i64, scratch_operands = 0 : i64, tpu.core_type = #tpu.core_type<tc>, window_params = [{transform_indices = @transform_0, window_bounds = array<i64: 2, 18, 18, 4>}, {pipeline_mode = #tpu.pipeline_mode<synchronous>, transform_indices = @transform_1, window_bounds = array<i64: 9, 4, 32>}, {pipeline_mode = #tpu.pipeline_mode<synchronous>, transform_indices = @transform_2, window_bounds = array<i64: 1, 32>}, {transform_indices = @transform_3, window_bounds = array<i64: 2, 16, 16, 32>}]} {
    %c0 = arith.constant 0 : index
    %c0_0 = arith.constant 0 : index
    %c0_1 = arith.constant 0 : index
    %0 = vector.load %arg2[%c0, %c0_0, %c0_1] : memref<9x4x32xf32, #tpu.memory_space<vmem>>, vector<9x4x32xf32>
    %c0_2 = arith.constant 0 : index
    %c0_3 = arith.constant 0 : index
    %1 = vector.load %arg3[%c0_2, %c0_3] : memref<1x32xf32, #tpu.memory_space<vmem>>, vector<1x32xf32>
    %2 = vector.shape_cast %1 : vector<1x32xf32> to vector<1x32xf32>
    %3 = vector.broadcast %2 : vector<1x32xf32> to vector<512x32xf32>
    %c0_4 = arith.constant 0 : index
    %c0_5 = arith.constant 0 : index
    %c0_6 = arith.constant 0 : index
    %c0_7 = arith.constant 0 : index
    %4 = vector.load %arg1[%c0_4, %c0_5, %c0_6, %c0_7] : memref<2x18x18x4xf32, #tpu.memory_space<vmem>>, vector<2x16x16x4xf32>
    %5 = vector.shape_cast %4 : vector<2x16x16x4xf32> to vector<512x4xf32>
    %6 = vector.extract_strided_slice %0 {offsets = [0, 0, 0], sizes = [1, 4, 32], strides = [1, 1, 1]} : vector<9x4x32xf32> to vector<1x4x32xf32>
    %7 = vector.shape_cast %6 : vector<1x4x32xf32> to vector<4x32xf32>
    %cst = arith.constant dense<0.000000e+00> : vector<512x32xf32>
    %8 = tpu.matmul %5, %7, %cst {dimension_numbers = #tpu.dot_dimension_numbers<[1], [0], [0], [1], [0, 0, 1, 1], [], []>} : vector<512x4xf32>, vector<4x32xf32>, vector<512x32xf32> -> vector<512x32xf32>
    %9 = arith.addf %3, %8 : vector<512x32xf32>
    %c0_8 = arith.constant 0 : index
    %c0_9 = arith.constant 0 : index
    %c1 = arith.constant 1 : index
    %c0_10 = arith.constant 0 : index
    %10 = vector.load %arg1[%c0_8, %c0_9, %c1, %c0_10] : memref<2x18x18x4xf32, #tpu.memory_space<vmem>>, vector<2x16x16x4xf32>
    %11 = vector.shape_cast %10 : vector<2x16x16x4xf32> to vector<512x4xf32>
    %12 = vector.extract_strided_slice %0 {offsets = [1, 0, 0], sizes = [1, 4, 32], strides = [1, 1, 1]} : vector<9x4x32xf32> to vector<1x4x32xf32>
    %13 = vector.shape_cast %12 : vector<1x4x32xf32> to vector<4x32xf32>
    %cst_11 = arith.constant dense<0.000000e+00> : vector<512x32xf32>
    %14 = tpu.matmul %11, %13, %cst_11 {dimension_numbers = #tpu.dot_dimension_numbers<[1], [0], [0], [1], [0, 0, 1, 1], [], []>} : vector<512x4xf32>, vector<4x32xf32>, vector<512x32xf32> -> vector<512x32xf32>
    %15 = arith.addf %9, %14 : vector<512x32xf32>
    %c0_12 = arith.constant 0 : index
    %c0_13 = arith.constant 0 : index
    %c2 = arith.constant 2 : index
    %c0_14 = arith.constant 0 : index
    %16 = vector.load %arg1[%c0_12, %c0_13, %c2, %c0_14] : memref<2x18x18x4xf32, #tpu.memory_space<vmem>>, vector<2x16x16x4xf32>
    %17 = vector.shape_cast %16 : vector<2x16x16x4xf32> to vector<512x4xf32>
    %18 = vector.extract_strided_slice %0 {offsets = [2, 0, 0], sizes = [1, 4, 32], strides = [1, 1, 1]} : vector<9x4x32xf32> to vector<1x4x32xf32>
    %19 = vector.shape_cast %18 : vector<1x4x32xf32> to vector<4x32xf32>
    %cst_15 = arith.constant dense<0.000000e+00> : vector<512x32xf32>
    %20 = tpu.matmul %17, %19, %cst_15 {dimension_numbers = #tpu.dot_dimension_numbers<[1], [0], [0], [1], [0, 0, 1, 1], [], []>} : vector<512x4xf32>, vector<4x32xf32>, vector<512x32xf32> -> vector<512x32xf32>
    %21 = arith.addf %15, %20 : vector<512x32xf32>
    %c0_16 = arith.constant 0 : index
    %c1_17 = arith.constant 1 : index
    %c0_18 = arith.constant 0 : index
    %c0_19 = arith.constant 0 : index
    %22 = vector.load %arg1[%c0_16, %c1_17, %c0_18, %c0_19] : memref<2x18x18x4xf32, #tpu.memory_space<vmem>>, vector<2x16x16x4xf32>
    %23 = vector.shape_cast %22 : vector<2x16x16x4xf32> to vector<512x4xf32>
    %24 = vector.extract_strided_slice %0 {offsets = [3, 0, 0], sizes = [1, 4, 32], strides = [1, 1, 1]} : vector<9x4x32xf32> to vector<1x4x32xf32>
    %25 = vector.shape_cast %24 : vector<1x4x32xf32> to vector<4x32xf32>
    %cst_20 = arith.constant dense<0.000000e+00> : vector<512x32xf32>
    %26 = tpu.matmul %23, %25, %cst_20 {dimension_numbers = #tpu.dot_dimension_numbers<[1], [0], [0], [1], [0, 0, 1, 1], [], []>} : vector<512x4xf32>, vector<4x32xf32>, vector<512x32xf32> -> vector<512x32xf32>
    %27 = arith.addf %21, %26 : vector<512x32xf32>
    %c0_21 = arith.constant 0 : index
    %c1_22 = arith.constant 1 : index
    %c1_23 = arith.constant 1 : index
    %c0_24 = arith.constant 0 : index
    %28 = vector.load %arg1[%c0_21, %c1_22, %c1_23, %c0_24] : memref<2x18x18x4xf32, #tpu.memory_space<vmem>>, vector<2x16x16x4xf32>
    %29 = vector.shape_cast %28 : vector<2x16x16x4xf32> to vector<512x4xf32>
    %30 = vector.extract_strided_slice %0 {offsets = [4, 0, 0], sizes = [1, 4, 32], strides = [1, 1, 1]} : vector<9x4x32xf32> to vector<1x4x32xf32>
    %31 = vector.shape_cast %30 : vector<1x4x32xf32> to vector<4x32xf32>
    %cst_25 = arith.constant dense<0.000000e+00> : vector<512x32xf32>
    %32 = tpu.matmul %29, %31, %cst_25 {dimension_numbers = #tpu.dot_dimension_numbers<[1], [0], [0], [1], [0, 0, 1, 1], [], []>} : vector<512x4xf32>, vector<4x32xf32>, vector<512x32xf32> -> vector<512x32xf32>
    %33 = arith.addf %27, %32 : vector<512x32xf32>
    %c0_26 = arith.constant 0 : index
    %c1_27 = arith.constant 1 : index
    %c2_28 = arith.constant 2 : index
    %c0_29 = arith.constant 0 : index
    %34 = vector.load %arg1[%c0_26, %c1_27, %c2_28, %c0_29] : memref<2x18x18x4xf32, #tpu.memory_space<vmem>>, vector<2x16x16x4xf32>
    %35 = vector.shape_cast %34 : vector<2x16x16x4xf32> to vector<512x4xf32>
    %36 = vector.extract_strided_slice %0 {offsets = [5, 0, 0], sizes = [1, 4, 32], strides = [1, 1, 1]} : vector<9x4x32xf32> to vector<1x4x32xf32>
    %37 = vector.shape_cast %36 : vector<1x4x32xf32> to vector<4x32xf32>
    %cst_30 = arith.constant dense<0.000000e+00> : vector<512x32xf32>
    %38 = tpu.matmul %35, %37, %cst_30 {dimension_numbers = #tpu.dot_dimension_numbers<[1], [0], [0], [1], [0, 0, 1, 1], [], []>} : vector<512x4xf32>, vector<4x32xf32>, vector<512x32xf32> -> vector<512x32xf32>
    %39 = arith.addf %33, %38 : vector<512x32xf32>
    %c0_31 = arith.constant 0 : index
    %c2_32 = arith.constant 2 : index
    %c0_33 = arith.constant 0 : index
    %c0_34 = arith.constant 0 : index
    %40 = vector.load %arg1[%c0_31, %c2_32, %c0_33, %c0_34] : memref<2x18x18x4xf32, #tpu.memory_space<vmem>>, vector<2x16x16x4xf32>
    %41 = vector.shape_cast %40 : vector<2x16x16x4xf32> to vector<512x4xf32>
    %42 = vector.extract_strided_slice %0 {offsets = [6, 0, 0], sizes = [1, 4, 32], strides = [1, 1, 1]} : vector<9x4x32xf32> to vector<1x4x32xf32>
    %43 = vector.shape_cast %42 : vector<1x4x32xf32> to vector<4x32xf32>
    %cst_35 = arith.constant dense<0.000000e+00> : vector<512x32xf32>
    %44 = tpu.matmul %41, %43, %cst_35 {dimension_numbers = #tpu.dot_dimension_numbers<[1], [0], [0], [1], [0, 0, 1, 1], [], []>} : vector<512x4xf32>, vector<4x32xf32>, vector<512x32xf32> -> vector<512x32xf32>
    %45 = arith.addf %39, %44 : vector<512x32xf32>
    %c0_36 = arith.constant 0 : index
    %c2_37 = arith.constant 2 : index
    %c1_38 = arith.constant 1 : index
    %c0_39 = arith.constant 0 : index
    %46 = vector.load %arg1[%c0_36, %c2_37, %c1_38, %c0_39] : memref<2x18x18x4xf32, #tpu.memory_space<vmem>>, vector<2x16x16x4xf32>
    %47 = vector.shape_cast %46 : vector<2x16x16x4xf32> to vector<512x4xf32>
    %48 = vector.extract_strided_slice %0 {offsets = [7, 0, 0], sizes = [1, 4, 32], strides = [1, 1, 1]} : vector<9x4x32xf32> to vector<1x4x32xf32>
    %49 = vector.shape_cast %48 : vector<1x4x32xf32> to vector<4x32xf32>
    %cst_40 = arith.constant dense<0.000000e+00> : vector<512x32xf32>
    %50 = tpu.matmul %47, %49, %cst_40 {dimension_numbers = #tpu.dot_dimension_numbers<[1], [0], [0], [1], [0, 0, 1, 1], [], []>} : vector<512x4xf32>, vector<4x32xf32>, vector<512x32xf32> -> vector<512x32xf32>
    %51 = arith.addf %45, %50 : vector<512x32xf32>
    %c0_41 = arith.constant 0 : index
    %c2_42 = arith.constant 2 : index
    %c2_43 = arith.constant 2 : index
    %c0_44 = arith.constant 0 : index
    %52 = vector.load %arg1[%c0_41, %c2_42, %c2_43, %c0_44] : memref<2x18x18x4xf32, #tpu.memory_space<vmem>>, vector<2x16x16x4xf32>
    %53 = vector.shape_cast %52 : vector<2x16x16x4xf32> to vector<512x4xf32>
    %54 = vector.extract_strided_slice %0 {offsets = [8, 0, 0], sizes = [1, 4, 32], strides = [1, 1, 1]} : vector<9x4x32xf32> to vector<1x4x32xf32>
    %55 = vector.shape_cast %54 : vector<1x4x32xf32> to vector<4x32xf32>
    %cst_45 = arith.constant dense<0.000000e+00> : vector<512x32xf32>
    %56 = tpu.matmul %53, %55, %cst_45 {dimension_numbers = #tpu.dot_dimension_numbers<[1], [0], [0], [1], [0, 0, 1, 1], [], []>} : vector<512x4xf32>, vector<4x32xf32>, vector<512x32xf32> -> vector<512x32xf32>
    %57 = arith.addf %51, %56 : vector<512x32xf32>
    %cst_46 = arith.constant 0.000000e+00 : f32
    %58 = vector.broadcast %cst_46 : f32 to vector<512x32xf32>
    %59 = arith.maximumf %57, %58 : vector<512x32xf32>
    %60 = vector.shape_cast %59 : vector<512x32xf32> to vector<2x16x16x32xf32>
    %c0_47 = arith.constant 0 : index
    %c0_48 = arith.constant 0 : index
    %c0_49 = arith.constant 0 : index
    %c0_50 = arith.constant 0 : index
    %61 = vector.load %arg4[%c0_47, %c0_48, %c0_49, %c0_50] : memref<2x16x16x32xf32, #tpu.memory_space<vmem>>, vector<2x16x16x32xf32>
    tpu.vector_store %arg4[%c0_47, %c0_48, %c0_49, %c0_50], %60 {strides = array<i32>} : memref<2x16x16x32xf32, #tpu.memory_space<vmem>>, vector<2x16x16x32xf32>,
    return
  }
  func.func @transform_0(%arg0: i32) -> (i32, i32, i32, i32) {
    %c0_i32 = arith.constant 0 : i32
    %c0_i32_0 = arith.constant 0 : i32
    %c0_i32_1 = arith.constant 0 : i32
    %c0_i32_2 = arith.constant 0 : i32
    return %arg0, %c0_i32, %c0_i32_0, %c0_i32_1 : i32, i32, i32, i32
  }
  func.func @transform_1(%arg0: i32) -> (i32, i32, i32) {
    %c0_i32 = arith.constant 0 : i32
    %c0_i32_0 = arith.constant 0 : i32
    %c0_i32_1 = arith.constant 0 : i32
    %c0_i32_2 = arith.constant 0 : i32
    return %c0_i32, %c0_i32_0, %c0_i32_1 : i32, i32, i32
  }
  func.func @transform_2(%arg0: i32) -> (i32, i32) {
    %c0_i32 = arith.constant 0 : i32
    %c0_i32_0 = arith.constant 0 : i32
    %c0_i32_1 = arith.constant 0 : i32
    return %c0_i32, %c0_i32_0 : i32, i32
  }
  func.func @transform_3(%arg0: i32) -> (i32, i32, i32, i32) {
    %c0_i32 = arith.constant 0 : i32
    %c0_i32_0 = arith.constant 0 : i32
    %c0_i32_1 = arith.constant 0 : i32
    %c0_i32_2 = arith.constant 0 : i32
    return %arg0, %c0_i32, %c0_i32_0, %c0_i32_1 : i32, i32, i32, i32
  }
}

</mosaic_0001>

<bundles_post_ra>
// kernel: tpu_custom_call.1
= control target key start
LH: loop header
LB: loop body
LE: loop exit
PB: predicated region body
PF: predicated region fallthrough
CT: control target
= control target key end

     0   :  { %vm288_vm0 = vcmask 1043456   ;;  %vm95_vm1 = vcmask 31744   ;;  %s12391_s0 = inlined_call_operand.vmem [shape: f32[2,18,18,4], index: 0, kind: input, shape index: {}]   ;;  %s12392_s1 = inlined_call_operand.vmem [shape: f32[9,4,32], index: 1, kind: input, shape index: {}]   ;;  %s12393_s2 = inlined_call_operand.vmem [shape: f32[1,32], index: 2, kind: input, shape index: {}]   ;;  %s12394_s3 = inlined_call_operand.hbm [shape: f32[2,16,16,32], index: 3, kind: output, shape index: {}]  }
   0x1   :  { %v15_v0 = vld [vmem:[%s12392_s1] sm:$0xf]  ;;  %v9624_v1 = vld [vmem:[%s12392_s1 + $0x10] sm:$0xf]  ;;  %v32_v4 = vld [vmem:[%s12391_s0 + $0x8] sm:$0xff] }
   0x2   :  { %12462 = vst [vmem:[#allocation5_spill] sm:$0xff] %v9624_v1  ;;  %v31_v2 = vld [vmem:[%s12391_s0] sm:$0xff]  ;;  %8107 = vmatprep.subr.msk.mxu1 %vm288_vm0, %v15_v0  ;;  %8499 = vmatprep.subr.msk.mxu0 %vm288_vm0, %v9624_v1  ;;  %v20_v7 = vld [vmem:[%s12392_s1 + $0x14] sm:$0xf]  ;;  %v33_v8 = vld [vmem:[%s12391_s0 + $0x18] sm:$0xff] }
   0x3   :  { %v9635_v3 = vld [vmem:[%s12391_s0 + $0x19] sm:$0xff]  ;;  %v16_v5 = vld [vmem:[%s12392_s1 + $0x4] sm:$0xf]  ;;  %8108 = vmatpush3.msk.msra.mxu1 %vm288_vm0, %v15_v0  ;;  %8109 = vmatprep.mubr.msk.f32.mxu1 %vm95_vm1, %v31_v2  ;;  %v9665_v9 = vld [vmem:[%s12391_s0 + $0x31] sm:$0xff] }
   0x4   :  { %v9648_v6 = vld [vmem:[%s12391_s0 + $0x21] sm:$0xff]  ;;  %8500 = vmatpush3.msk.msra.mxu0 %vm288_vm0, %v9624_v1  ;;  %8501 = vmatprep.mubr.msk.f32.mxu0 %vm95_vm1, %v9635_v3  ;;  %v9678_v11 = vld [vmem:[%s12391_s0 + $0x39] sm:$0xff]  ;;  %v9683_v12 = vld [vmem:[%s12391_s0 + $0x30] sm:$0xff] }
   0x5   :  { %8110 = vmatmul.mubr.msk.f32.vlgmr.msra.gmra.mrb[0].mxu1 %vm95_vm1, %v32_v4  ;;  %8205 = vmatprep.subr.msk.mxu1 %vm288_vm0, %v16_v5  ;;  %v34_v10 = vld [vmem:[%s12391_s0 + $0x20] sm:$0xff]  ;;  %v9691_v13 = vld [vmem:[%s12391_s0 + $0x49] sm:$0xff]  ;;  %v9701_v14 = vld [vmem:[%s12391_s0 + $0x38] sm:$0xff] }
   0x6   :  { %8502 = vmatmul.mubr.msk.f32.vlgmr.msra.gmra.mrb[0].mxu0 %vm95_vm1, %v9648_v6  ;;  %8206 = vmatpush3.msk.msra.mxu1 %vm288_vm0, %v16_v5  ;;  %v9708_v15 = vld [vmem:[%s12391_s0 + $0x51] sm:$0xff]  ;;  %v9713_v16 = vld [vmem:[%s12391_s0 + $0x48] sm:$0xff]  ;;  %v9741_v20 = vld [vmem:[%s12391_s0 + $0x60] sm:$0xff] }
   0x7   :  { %8597 = vmatprep.subr.msk.mxu0 %vm288_vm0, %v20_v7  ;;  %8112 = vmatprep.mubr.msk.f32.mxu1 %vm95_vm1, %v33_v8  ;;  %v9718_v17 = vld [vmem:[%s12391_s0 + $0x61] sm:$0xff]  ;;  %v9729_v18 = vld [vmem:[%s12391_s0 + $0x50] sm:$0xff]  ;;  %v9746_v21 = vld [vmem:[%s12391_s0 + $0x79] sm:$0xff] }
   0x8   :  { %8504 = vmatprep.mubr.msk.f32.mxu0 %vm95_vm1, %v9665_v9  ;;  %8598 = vmatpush3.msk.msra.mxu0 %vm288_vm0, %v20_v7  ;;  %v9736_v19 = vld [vmem:[%s12391_s0 + $0x69] sm:$0xff]  ;;  %v9764_v23 = vld [vmem:[%s12391_s0 + $0x81] sm:$0xff]  ;;  %v9769_v24 = vld [vmem:[%s12391_s0 + $0x78] sm:$0xff] }
   0x9   :  { %8113 = vmatmul.mubr.msk.f32.gmra.mrb[2].mxu1 %vm95_vm1, %v34_v10  ;;  %v9757_v22 = vld [vmem:[%s12391_s0 + $0x68] sm:$0xff]  ;;  %v9774_v25 = vld [vmem:[%s12391_s0 + $0x91] sm:$0xff]  ;;  %v9785_v26 = vld [vmem:[%s12391_s0 + $0x80] sm:$0xff] }
   0xa   :  { %8505 = vmatmul.mubr.msk.f32.gmra.mrb[2].mxu0 %vm95_vm1, %v9678_v11  ;;  %8115 = vmatprep.mubr.msk.f32.mxu1 %vm95_vm1, %v9683_v12  ;;  %v9792_v27 = vld [vmem:[%s12391_s0 + $0x99] sm:$0xff]  ;;  %v9797_v28 = vld [vmem:[%s12391_s0 + $0x90] sm:$0xff]  ;;  %v9830_v33 = vld [vmem:[%s12391_s0 + $0xa8] sm:$0xff] }
   0xb   :  { %8507 = vmatprep.mubr.msk.f32.mxu0 %vm95_vm1, %v9691_v13  ;;  %v9802_v29 = vld [vmem:[%s12391_s0 + $0xa9] sm:$0xff]  ;;  %v9809_v30 = vld [vmem:[%s12392_s1 + $0x18] sm:$0xf]  ;;  %v9837_v34 = vld [vmem:[%s12391_s0 + $0xc1] sm:$0xff] }
   0xc   :  { %v9818_v31 = vld [vmem:[%s12391_s0 + $0x98] sm:$0xff]  ;;  %8695 = vmatprep.subr.msk.mxu0 %vm288_vm0, %v9809_v30  ;;  %v9848_v35 = vld [vmem:[%s12391_s0 + $0xb0] sm:$0xff]  ;;  %v9860_v37 = vld [vmem:[%s12391_s0 + $0xc0] sm:$0xff] }
   0xd   :  { %8116 = vmatmul.mubr.msk.f32.gmra.mrb[4].mxu1 %vm95_vm1, %v9701_v14  ;;  %v9825_v32 = vld [vmem:[%s12391_s0 + $0xb1] sm:$0xff]  ;;  %v9855_v36 = vld [vmem:[%s12391_s0 + $0xc9] sm:$0xff]  ;;  %v9865_v38 = vld [vmem:[%s12391_s0 + $0xd9] sm:$0xff] }
   0xe   :  { %8508 = vmatmul.mubr.msk.f32.gmra.mrb[4].mxu0 %vm95_vm1, %v9708_v15  ;;  %8118 = vmatprep.mubr.msk.f32.mxu1 %vm95_vm1, %v9713_v16  ;;  %v9876_v39 = vld [vmem:[%s12391_s0 + $0xc8] sm:$0xff]  ;;  %v9888_v41 = vld [vmem:[%s12391_s0 + $0xd8] sm:$0xff]  ;;  %v9904_v43 = vld [vmem:[%s12391_s0 + $0xe0] sm:$0xff] }
   0xf   :  { %8510 = vmatprep.mubr.msk.f32.mxu0 %vm95_vm1, %v9718_v17  ;;  %v9883_v40 = vld [vmem:[%s12391_s0 + $0xe1] sm:$0xff]  ;;  %v9893_v42 = vld [vmem:[%s12391_s0 + $0xf1] sm:$0xff]  ;;  %v9911_v44 = vld [vmem:[%s12391_s0 + $0xf9] sm:$0xff] }
  0x10   :  { %v9916_v45 = vld [vmem:[%s12391_s0 + $0xf0] sm:$0xff]  ;;  %v9932_v47 = vld [vmem:[%s12391_s0 + $0xf8] sm:$0xff]  ;;  %v9944_v49 = vld [vmem:[%s12391_s0 + $0x108] sm:$0xff] }
  0x11   :  { %8119 = vmatmul.mubr.msk.f32.gmra.mrb[6].mxu1 %vm95_vm1, %v9729_v18  ;;  %v9921_v46 = vld [vmem:[%s12391_s0 + $0x109] sm:$0xff]  ;;  %v9939_v48 = vld [vmem:[%s12391_s0 + $0x111] sm:$0xff]  ;;  %v9949_v50 = vld [vmem:[%s12391_s0 + $0x121] sm:$0xff] }
  0x12   :  { %8511 = vmatmul.mubr.msk.f32.gmra.mrb[6].mxu0 %vm95_vm1, %v9736_v19  ;;  %8121 = vmatprep.mubr.msk.f32.mxu1 %vm95_vm1, %v9741_v20  ;;  %v9960_v51 = vld [vmem:[%s12391_s0 + $0x110] sm:$0xff]  ;;  %v9965_v52 = vld [vmem:[%s12392_s1 + $0x8] sm:$0xf]  ;;  %v9977_v54 = vld [vmem:[%s12391_s0 + $0x120] sm:$0xff] }
  0x13   :  { %8513 = vmatprep.mubr.msk.f32.mxu0 %vm95_vm1, %v9746_v21  ;;  %v9972_v53 = vld [vmem:[%s12391_s0 + $0x129] sm:$0xff]  ;;  %8303 = vmatprep.subr.msk.mxu1 %vm288_vm0, %v9965_v52  ;;  %v9984_v55 = vld [vmem:[%s12391_s0 + $0x139] sm:$0xff]  ;;  %v10002_v57 = vld [vmem:[%s12391_s0 + $0x141] sm:$0xff] }
  0x14   :  { %v9995_v56 = vld [vmem:[%s12391_s0 + $0x128] sm:$0xff]  ;;  %v10007_v58 = vld [vmem:[%s12391_s0 + $0x138] sm:$0xff]  ;;  %v10023_v60 = vld [vmem:[%s12391_s0 + $0x140] sm:$0xff] }
  0x15   :  { %8122 = vmatmul.mubr.msk.f32.gmra.mrb[8].mxu1 %vm95_vm1, %v9757_v22  ;;  %v10012_v59 = vld [vmem:[%s12391_s0 + $0x151] sm:$0xff]  ;;  %v10030_v61 = vld [vmem:[%s12391_s0 + $0x159] sm:$0xff] }
  0x16   :  { %8514 = vmatmul.mubr.msk.f32.gmra.mrb[8].mxu0 %vm95_vm1, %v9764_v23  ;;  %8124 = vmatprep.mubr.msk.f32.mxu1 %vm95_vm1, %v9769_v24  ;;  %v10035_v62 = vld [vmem:[%s12391_s0 + $0x150] sm:$0xff] }
  0x17   :  { %8516 = vmatprep.mubr.msk.f32.mxu0 %vm95_vm1, %v9774_v25 }
  0x19   :  { %8125 = vmatmul.mubr.msk.f32.gmra.mrb[10].mxu1 %vm95_vm1, %v9785_v26 }
  0x1a   :  { %8517 = vmatmul.mubr.msk.f32.gmra.mrb[10].mxu0 %vm95_vm1, %v9792_v27  ;;  %8127 = vmatprep.mubr.msk.f32.mxu1 %vm95_vm1, %v9797_v28 }
  0x1b   :  { %8519 = vmatprep.mubr.msk.f32.mxu0 %vm95_vm1, %v9802_v29 }
  0x1d   :  { %8128 = vmatmul.mubr.msk.f32.gmra.mrb[12].mxu1 %vm95_vm1, %v9818_v31 }
  0x1e   :  { %8520 = vmatmul.mubr.msk.f32.gmra.mrb[12].mxu0 %vm95_vm1, %v9825_v32  ;;  %8130 = vmatprep.mubr.msk.f32.mxu1 %vm95_vm1, %v9830_v33 }
  0x1f   :  { %8522 = vmatprep.mubr.msk.f32.mxu0 %vm95_vm1, %v9837_v34 }
  0x21   :  { %8131 = vmatmul.mubr.msk.f32.gmra.mrb[14].mxu1 %vm95_vm1, %v9848_v35 }
  0x22   :  { %8523 = vmatmul.mubr.msk.f32.gmra.mrb[14].mxu0 %vm95_vm1, %v9855_v36  ;;  %8133 = vmatprep.mubr.msk.f32.mxu1 %vm95_vm1, %v9860_v37 }
  0x23   :  { %8525 = vmatprep.mubr.msk.f32.mxu0 %vm95_vm1, %v9865_v38 }
  0x25   :  { %8134 = vmatmul.mubr.msk.f32.gmra.mrb[16].mxu1 %vm95_vm1, %v9876_v39 }
  0x26   :  { %8526 = vmatmul.mubr.msk.f32.gmra.mrb[16].mxu0 %vm95_vm1, %v9883_v40  ;;  %8136 = vmatprep.mubr.msk.f32.mxu1 %vm95_vm1, %v9888_v41 }
  0x27   :  { %8528 = vmatprep.mubr.msk.f32.mxu0 %vm95_vm1, %v9893_v42 }
  0x29   :  { %8137 = vmatmul.mubr.msk.f32.gmra.mrb[18].mxu1 %vm95_vm1, %v9904_v43 }
  0x2a   :  { %8529 = vmatmul.mubr.msk.f32.gmra.mrb[18].mxu0 %vm95_vm1, %v9911_v44  ;;  %8139 = vmatprep.mubr.msk.f32.mxu1 %vm95_vm1, %v9916_v45 }
  0x2b   :  { %8531 = vmatprep.mubr.msk.f32.mxu0 %vm95_vm1, %v9921_v46 }
  0x2d   :  { %8140 = vmatmul.mubr.msk.f32.gmra.mrb[20].mxu1 %vm95_vm1, %v9932_v47 }
  0x2e   :  { %8532 = vmatmul.mubr.msk.f32.gmra.mrb[20].mxu0 %vm95_vm1, %v9939_v48  ;;  %8142 = vmatprep.mubr.msk.f32.mxu1 %vm95_vm1, %v9944_v49 }
  0x2f   :  { %8534 = vmatprep.mubr.msk.f32.mxu0 %vm95_vm1, %v9949_v50 }
  0x31   :  { %8143 = vmatmul.mubr.msk.f32.gmra.mrb[22].mxu1 %vm95_vm1, %v9960_v51 }
  0x32   :  { %8535 = vmatmul.mubr.msk.f32.gmra.mrb[22].mxu0 %vm95_vm1, %v9972_v53  ;;  %8145 = vmatprep.mubr.msk.f32.mxu1 %vm95_vm1, %v9977_v54 }
  0x33   :  { %8537 = vmatprep.mubr.msk.f32.mxu0 %vm95_vm1, %v9984_v55 }
  0x35   :  { %8146 = vmatmul.mubr.msk.f32.gmra.mrb[24].mxu1 %vm95_vm1, %v9995_v56 }
  0x36   :  { %8538 = vmatmul.mubr.msk.f32.gmra.mrb[24].mxu0 %vm95_vm1, %v10002_v57  ;;  %8148 = vmatprep.mubr.msk.f32.mxu1 %vm95_vm1, %v10007_v58 }
  0x37   :  { %8540 = vmatprep.mubr.msk.f32.mxu0 %vm95_vm1, %v10012_v59 }
  0x38   :  { %8 = vsyncpa [#allocation3], 0  ;;  %v10040_v63 = vld [vmem:[%s12391_s0 + $0x169] sm:$0xff]  ;;  %v10051_v0 = vld [vmem:[%s12391_s0 + $0x158] sm:$0xff]  ;;  %vm6471_vm2 = vcmask 261120  }
  0x39   :  { %8149 = vmatmul.mubr.msk.f32.gmra.mrb[26].mxu1 %vm95_vm1, %v10023_v60  ;;  %v10058_v2 = vld [vmem:[%s12391_s0 + $0x171] sm:$0xff]  ;;  %v10063_v4 = vld [vmem:[%s12391_s0 + $0x168] sm:$0xff]  ;;  %v10089_v1 = vld [vmem:[%s12391_s0 + $0x1a] sm:$0xff] }
  0x3a   :  { %8541 = vmatmul.mubr.msk.f32.gmra.mrb[26].mxu0 %vm95_vm1, %v10030_v61  ;;  %8151 = vmatprep.mubr.msk.f32.mxu1 %vm95_vm1, %v10035_v62  ;;  %12463 = vst [vmem:[#allocation6_spill] sm:$0xff] %v10063_v4  ;;  %v6907_v5 = vld [vmem:[%s12391_s0 + $0x181] sm:$0xff]  ;;  %v10077_v7 = vld [vmem:[%s12391_s0 + $0x170] sm:$0xff]  ;;  %12465 = vst [vmem:[#allocation8_spill] sm:$0xff] %v10089_v1 }
  0x3b   :  { %8543 = vmatprep.mubr.msk.f32.mxu0 %vm95_vm1, %v10040_v63  ;;  %12464 = vst [vmem:[#allocation7_spill] sm:$0xff] %v10077_v7  ;;  %v6908_v8 = vld [vmem:[%s12391_s0 + $0x189] sm:$0xff] }
  0x3c   :  { %v63_v10 = vld [vmem:[%s12391_s0 + $0x1b0] sm:$0xff] }
  0x3d   :  { %8152 = vmatmul.mubr.msk.f32.gmra.mrb[28].mxu1 %vm95_vm1, %v10051_v0 }
  0x3e   :  { %8544 = vmatmul.mubr.msk.f32.gmra.mrb[28].mxu0 %vm95_vm1, %v10058_v2  ;;  %8154 = vmatprep.mubr.msk.f32.mxu1 %vm95_vm1, %v10063_v4  ;;  %v10103_v4 = vld [vmem:[%s12391_s0 + $0x22] sm:$0xff] }
  0x3f   :  { %8546 = vmatprep.mubr.msk.f32.mxu0 %vm95_vm1, %v6907_v5  ;;  %v64_v5 = vld [vmem:[%s12391_s0 + $0x1b8] sm:$0xff]  ;;  %12466 = vst [vmem:[#allocation9_spill] sm:$0xff] %v10103_v4 }
  0x41   :  { %8155 = vmatmul.mubr.msk.f32.gmra.mrb[30].mxu1 %vm95_vm1, %v10077_v7  ;;  %v65_v7 = vld [vmem:[%s12391_s0 + $0x1c8] sm:$0xff] }
  0x42   :  { %8547 = vmatmul.mubr.msk.f32.gmra.mrb[30].mxu0 %vm95_vm1, %v6908_v8  ;;  %8157 = vmatprep.mubr.msk.f32.mxu1 %vm95_vm1, %v63_v10  ;;  %v10111_v8 = vld [vmem:[%s12391_s0 + $0x32] sm:$0xff] }
  0x43   :  { %8599 = vmatprep.mubr.msk.f32.mxu0 %vm95_vm1, %v10089_v1  ;;  %12467 = vst [vmem:[#allocation10_spill] sm:$0xff] %v10111_v8  ;;  %v66_v10 = vld [vmem:[%s12391_s0 + $0x1d0] sm:$0xff]  ;;  %v10123_v1 = vld [vmem:[%s12392_s1 + $0x1c] sm:$0xf] }
  0x45   :  { %8158 = vmatmul.mubr.msk.f32.gmra.mrb[32].mxu1 %vm95_vm1, %v64_v5  ;;  %v10132_v5 = vld [vmem:[%s12391_s0 + $0x3a] sm:$0xff] }
  0x46   :  { %8600 = vmatmul.mubr.msk.f32.vlgmr.msra.gmra.mrb[0].mxu0 %vm95_vm1, %v10103_v4  ;;  %8160 = vmatprep.mubr.msk.f32.mxu1 %vm95_vm1, %v65_v7  ;;  %12468 = vst [vmem:[#allocation11_spill] sm:$0xff] %v10132_v5  ;;  %v10137_v7 = vld [vmem:[%s12391_s0 + $0x1e0] sm:$0xff]  ;;  %v10142_v4 = vld [vmem:[%s12391_s0 + $0x4a] sm:$0xff] }
  0x47   :  { %8602 = vmatprep.mubr.msk.f32.mxu0 %vm95_vm1, %v10111_v8  ;;  %8696 = vmatpush3.msk.msra.mxu0 %vm288_vm0, %v9809_v30  ;;  %12469 = vst [vmem:[#allocation12_spill] sm:$0xff] %v10137_v7  ;;  %12470 = vst [vmem:[#allocation13_spill] sm:$0xff] %v10142_v4  ;;  %v10154_v30 = vld [vmem:[%s12391_s0 + $0x1e8] sm:$0xff]  ;;  %v10161_v8 = vld [vmem:[%s12391_s0 + $0x52] sm:$0xff] }
  0x48   :  { %8793 = vmatprep.subr.msk.mxu0 %vm288_vm0, %v10123_v1  ;;  %12471 = vst [vmem:[#allocation14_spill] sm:$0xff] %v10154_v30  ;;  %12472 = vst [vmem:[#allocation15_spill] sm:$0xff] %v10161_v8 }
  0x49   :  { %8161 = vmatmul.mubr.msk.f32.gmra.mrb[34].mxu1 %vm95_vm1, %v66_v10  ;;  %v10166_v10 = vld [vmem:[%s12391_s0 + $0x1f8] sm:$0xff] }
  0x4a   :  { %8603 = vmatmul.mubr.msk.f32.gmra.mrb[2].mxu0 %vm95_vm1, %v10132_v5  ;;  %8163 = vmatprep.mubr.msk.f32.mxu1 %vm95_vm1, %v10137_v7  ;;  %12473 = vst [vmem:[#allocation16_spill] sm:$0xff] %v10166_v10  ;;  %v10171_v5 = vld [vmem:[%s12391_s0 + $0x62] sm:$0xff]  ;;  %v10189_v7 = vld [vmem:[%s12391_s0 + $0x6a] sm:$0xff] }
  0x4b   :  { %8605 = vmatprep.mubr.msk.f32.mxu0 %vm95_vm1, %v10142_v4  ;;  %12474 = vst [vmem:[#allocation17_spill] sm:$0xff] %v10171_v5  ;;  %v10182_v4 = vld [vmem:[%s12391_s0 + $0x200] sm:$0xff]  ;;  %12476 = vst [vmem:[#allocation19_spill] sm:$0xff] %v10189_v7 }
  0x4c   :  { %12475 = vst [vmem:[#allocation18_spill] sm:$0xff] %v10182_v4 }
  0x4d   :  { %8164 = vmatmul.mubr.msk.f32.gmra.mrb[36].mxu1 %vm95_vm1, %v10154_v30  ;;  %v10217_v30 = vld [vmem:[%s12391_s0 + $0x82] sm:$0xff] }
  0x4e   :  { %8606 = vmatmul.mubr.msk.f32.gmra.mrb[4].mxu0 %vm95_vm1, %v10161_v8  ;;  %8166 = vmatprep.mubr.msk.f32.mxu1 %vm95_vm1, %v10166_v10  ;;  %v10194_v8 = vld [vmem:[%s12391_s0 + $0x210] sm:$0xff]  ;;  %v10199_v10 = vld [vmem:[%s12391_s0 + $0x7a] sm:$0xff]  ;;  %12480 = vst [vmem:[#allocation23_spill] sm:$0xff] %v10217_v30 }
  0x4f   :  { %8608 = vmatprep.mubr.msk.f32.mxu0 %vm95_vm1, %v10171_v5  ;;  %12477 = vst [vmem:[#allocation20_spill] sm:$0xff] %v10194_v8  ;;  %12478 = vst [vmem:[#allocation21_spill] sm:$0xff] %v10199_v10  ;;  %v10210_v5 = vld [vmem:[%s12391_s0 + $0x218] sm:$0xff] }
  0x50   :  { %12479 = vst [vmem:[#allocation22_spill] sm:$0xff] %v10210_v5 }
  0x51   :  { %8167 = vmatmul.mubr.msk.f32.gmra.mrb[38].mxu1 %vm95_vm1, %v10182_v4  ;;  %v10245_v4 = vld [vmem:[%s12391_s0 + $0x9a] sm:$0xff] }
  0x52   :  { %8609 = vmatmul.mubr.msk.f32.gmra.mrb[6].mxu0 %vm95_vm1, %v10189_v7  ;;  %8169 = vmatprep.mubr.msk.f32.mxu1 %vm95_vm1, %v10194_v8  ;;  %v10222_v7 = vld [vmem:[%s12391_s0 + $0x228] sm:$0xff]  ;;  %v10227_v8 = vld [vmem:[%s12391_s0 + $0x92] sm:$0xff]  ;;  %12484 = vst [vmem:[#allocation27_spill] sm:$0xff] %v10245_v4 }
  0x53   :  { %8611 = vmatprep.mubr.msk.f32.mxu0 %vm95_vm1, %v10199_v10  ;;  %12481 = vst [vmem:[#allocation24_spill] sm:$0xff] %v10222_v7  ;;  %12482 = vst [vmem:[#allocation25_spill] sm:$0xff] %v10227_v8  ;;  %v10238_v10 = vld [vmem:[%s12391_s0 + $0x230] sm:$0xff] }
  0x54   :  { %12483 = vst [vmem:[#allocation26_spill] sm:$0xff] %v10238_v10 }
  0x55   :  { %8170 = vmatmul.mubr.msk.f32.gmra.mrb[40].mxu1 %vm95_vm1, %v10210_v5  ;;  %v10273_v5 = vld [vmem:[%s12391_s0 + $0xb2] sm:$0xff] }
  0x56   :  { %8612 = vmatmul.mubr.msk.f32.gmra.mrb[8].mxu0 %vm95_vm1, %v10217_v30  ;;  %8172 = vmatprep.mubr.msk.f32.mxu1 %vm95_vm1, %v10222_v7  ;;  %v10250_v30 = vld [vmem:[%s12391_s0 + $0x240] sm:$0xff]  ;;  %v10255_v7 = vld [vmem:[%s12391_s0 + $0xaa] sm:$0xff]  ;;  %12488 = vst [vmem:[#allocation31_spill] sm:$0xff] %v10273_v5 }
  0x57   :  { %8614 = vmatprep.mubr.msk.f32.mxu0 %vm95_vm1, %v10227_v8  ;;  %12485 = vst [vmem:[#allocation28_spill] sm:$0xff] %v10250_v30  ;;  %12486 = vst [vmem:[#allocation29_spill] sm:$0xff] %v10255_v7  ;;  %v10266_v8 = vld [vmem:[%s12391_s0 + $0x248] sm:$0xff] }
  0x58   :  { %12487 = vst [vmem:[#allocation30_spill] sm:$0xff] %v10266_v8 }
  0x59   :  { %8173 = vmatmul.mubr.msk.f32.gmra.mrb[42].mxu1 %vm95_vm1, %v10238_v10  ;;  %v10301_v10 = vld [vmem:[%s12391_s0 + $0xca] sm:$0xff] }
  0x5a   :  { %8615 = vmatmul.mubr.msk.f32.gmra.mrb[10].mxu0 %vm95_vm1, %v10245_v4  ;;  %8175 = vmatprep.mubr.msk.f32.mxu1 %vm95_vm1, %v10250_v30  ;;  %v10278_v4 = vld [vmem:[%s12391_s0 + $0x258] sm:$0xff]  ;;  %v10283_v30 = vld [vmem:[%s12391_s0 + $0xc2] sm:$0xff]  ;;  %12492 = vst [vmem:[#allocation35_spill] sm:$0xff] %v10301_v10 }
  0x5b   :  { %8617 = vmatprep.mubr.msk.f32.mxu0 %vm95_vm1, %v10255_v7  ;;  %12489 = vst [vmem:[#allocation32_spill] sm:$0xff] %v10278_v4  ;;  %12490 = vst [vmem:[#allocation33_spill] sm:$0xff] %v10283_v30  ;;  %v10294_v7 = vld [vmem:[%s12391_s0 + $0x260] sm:$0xff] }
  0x5c   :  { %12491 = vst [vmem:[#allocation34_spill] sm:$0xff] %v10294_v7 }
  0x5d   :  { %8176 = vmatmul.mubr.msk.f32.gmra.mrb[44].mxu1 %vm95_vm1, %v10266_v8  ;;  %v10329_v8 = vld [vmem:[%s12391_s0 + $0xe2] sm:$0xff] }
  0x5e   :  { %8618 = vmatmul.mubr.msk.f32.gmra.mrb[12].mxu0 %vm95_vm1, %v10273_v5  ;;  %8178 = vmatprep.mubr.msk.f32.mxu1 %vm95_vm1, %v10278_v4  ;;  %v10306_v5 = vld [vmem:[%s12391_s0 + $0x270] sm:$0xff]  ;;  %v10311_v4 = vld [vmem:[%s12391_s0 + $0xda] sm:$0xff]  ;;  %12496 = vst [vmem:[#allocation39_spill] sm:$0xff] %v10329_v8 }
  0x5f   :  { %8620 = vmatprep.mubr.msk.f32.mxu0 %vm95_vm1, %v10283_v30  ;;  %12493 = vst [vmem:[#allocation36_spill] sm:$0xff] %v10306_v5  ;;  %12494 = vst [vmem:[#allocation37_spill] sm:$0xff] %v10311_v4  ;;  %v10322_v30 = vld [vmem:[%s12391_s0 + $0x278] sm:$0xff] }
  0x60   :  { %12495 = vst [vmem:[#allocation38_spill] sm:$0xff] %v10322_v30 }
  0x61   :  { %8179 = vmatmul.mubr.msk.f32.gmra.mrb[46].mxu1 %vm95_vm1, %v10294_v7  ;;  %v10357_v7 = vld [vmem:[%s12391_s0 + $0xfa] sm:$0xff] }
  0x62   :  { %8621 = vmatmul.mubr.msk.f32.gmra.mrb[14].mxu0 %vm95_vm1, %v10301_v10  ;;  %8181 = vmatprep.mubr.msk.f32.mxu1 %vm95_vm1, %v10306_v5  ;;  %v10334_v10 = vld [vmem:[%s12391_s0 + $0x288] sm:$0xff]  ;;  %v10339_v5 = vld [vmem:[%s12391_s0 + $0xf2] sm:$0xff]  ;;  %12500 = vst [vmem:[#allocation43_spill] sm:$0xff] %v10357_v7 }
  0x63   :  { %8623 = vmatprep.mubr.msk.f32.mxu0 %vm95_vm1, %v10311_v4  ;;  %12497 = vst [vmem:[#allocation40_spill] sm:$0xff] %v10334_v10  ;;  %12498 = vst [vmem:[#allocation41_spill] sm:$0xff] %v10339_v5  ;;  %v10350_v4 = vld [vmem:[%s12391_s0 + $0x290] sm:$0xff] }
  0x64   :  { %12499 = vst [vmem:[#allocation42_spill] sm:$0xff] %v10350_v4 }
  0x65   :  { %8182 = vmatmul.mubr.msk.f32.gmra.mrb[48].mxu1 %vm95_vm1, %v10322_v30  ;;  %v10385_v30 = vld [vmem:[%s12391_s0 + $0x112] sm:$0xff] }
  0x66   :  { %8624 = vmatmul.mubr.msk.f32.gmra.mrb[16].mxu0 %vm95_vm1, %v10329_v8  ;;  %8184 = vmatprep.mubr.msk.f32.mxu1 %vm95_vm1, %v10334_v10  ;;  %v10362_v8 = vld [vmem:[%s12391_s0 + $0x2a0] sm:$0xff]  ;;  %v10367_v10 = vld [vmem:[%s12391_s0 + $0x10a] sm:$0xff]  ;;  %12504 = vst [vmem:[#allocation47_spill] sm:$0xff] %v10385_v30 }
  0x67   :  { %8626 = vmatprep.mubr.msk.f32.mxu0 %vm95_vm1, %v10339_v5  ;;  %12501 = vst [vmem:[#allocation44_spill] sm:$0xff] %v10362_v8  ;;  %12502 = vst [vmem:[#allocation45_spill] sm:$0xff] %v10367_v10  ;;  %v10378_v5 = vld [vmem:[%s12391_s0 + $0x2a8] sm:$0xff] }
  0x68   :  { %12503 = vst [vmem:[#allocation46_spill] sm:$0xff] %v10378_v5 }
  0x69   :  { %8185 = vmatmul.mubr.msk.f32.gmra.mrb[50].mxu1 %vm95_vm1, %v10350_v4  ;;  %v10413_v4 = vld [vmem:[%s12391_s0 + $0x12a] sm:$0xff] }
  0x6a   :  { %8627 = vmatmul.mubr.msk.f32.gmra.mrb[18].mxu0 %vm95_vm1, %v10357_v7  ;;  %8187 = vmatprep.mubr.msk.f32.mxu1 %vm95_vm1, %v10362_v8  ;;  %v10390_v7 = vld [vmem:[%s12391_s0 + $0x2b8] sm:$0xff]  ;;  %v10395_v8 = vld [vmem:[%s12391_s0 + $0x122] sm:$0xff]  ;;  %12508 = vst [vmem:[#allocation51_spill] sm:$0xff] %v10413_v4 }
  0x6b   :  { %8629 = vmatprep.mubr.msk.f32.mxu0 %vm95_vm1, %v10367_v10  ;;  %12505 = vst [vmem:[#allocation48_spill] sm:$0xff] %v10390_v7  ;;  %12506 = vst [vmem:[#allocation49_spill] sm:$0xff] %v10395_v8  ;;  %v10406_v10 = vld [vmem:[%s12391_s0 + $0x2c0] sm:$0xff] }
  0x6c   :  { %12507 = vst [vmem:[#allocation50_spill] sm:$0xff] %v10406_v10 }
  0x6d   :  { %8188 = vmatmul.mubr.msk.f32.gmra.mrb[52].mxu1 %vm95_vm1, %v10378_v5  ;;  %v10441_v5 = vld [vmem:[%s12391_s0 + $0x142] sm:$0xff] }
  0x6e   :  { %8630 = vmatmul.mubr.msk.f32.gmra.mrb[20].mxu0 %vm95_vm1, %v10385_v30  ;;  %8190 = vmatprep.mubr.msk.f32.mxu1 %vm95_vm1, %v10390_v7  ;;  %v10418_v30 = vld [vmem:[%s12391_s0 + $0x2d0] sm:$0xff]  ;;  %v10423_v7 = vld [vmem:[%s12391_s0 + $0x13a] sm:$0xff]  ;;  %12512 = vst [vmem:[#allocation55_spill] sm:$0xff] %v10441_v5 }
  0x6f   :  { %8632 = vmatprep.mubr.msk.f32.mxu0 %vm95_vm1, %v10395_v8  ;;  %12509 = vst [vmem:[#allocation52_spill] sm:$0xff] %v10418_v30  ;;  %12510 = vst [vmem:[#allocation53_spill] sm:$0xff] %v10423_v7  ;;  %v10434_v8 = vld [vmem:[%s12391_s0 + $0x2d8] sm:$0xff] }
  0x70   :  { %12511 = vst [vmem:[#allocation54_spill] sm:$0xff] %v10434_v8 }
  0x71   :  { %8191 = vmatmul.mubr.msk.f32.gmra.mrb[54].mxu1 %vm95_vm1, %v10406_v10  ;;  %v10469_v10 = vld [vmem:[%s12391_s0 + $0x15a] sm:$0xff] }
  0x72   :  { %8633 = vmatmul.mubr.msk.f32.gmra.mrb[22].mxu0 %vm95_vm1, %v10413_v4  ;;  %8193 = vmatprep.mubr.msk.f32.mxu1 %vm95_vm1, %v10418_v30  ;;  %v10446_v4 = vld [vmem:[%s12391_s0 + $0x2e8] sm:$0xff]  ;;  %v10451_v30 = vld [vmem:[%s12391_s0 + $0x152] sm:$0xff]  ;;  %12516 = vst [vmem:[#allocation59_spill] sm:$0xff] %v10469_v10 }
  0x73   :  { %8635 = vmatprep.mubr.msk.f32.mxu0 %vm95_vm1, %v10423_v7  ;;  %12513 = vst [vmem:[#allocation56_spill] sm:$0xff] %v10446_v4  ;;  %12514 = vst [vmem:[#allocation57_spill] sm:$0xff] %v10451_v30  ;;  %v10462_v7 = vld [vmem:[%s12391_s0 + $0x2f0] sm:$0xff] }
  0x74   :  { %12515 = vst [vmem:[#allocation58_spill] sm:$0xff] %v10462_v7 }
  0x75   :  { %8194 = vmatmul.mubr.msk.f32.gmra.mrb[56].mxu1 %vm95_vm1, %v10434_v8  ;;  %v10497_v8 = vld [vmem:[%s12391_s0 + $0x172] sm:$0xff] }
  0x76   :  { %8636 = vmatmul.mubr.msk.f32.gmra.mrb[24].mxu0 %vm95_vm1, %v10441_v5  ;;  %8196 = vmatprep.mubr.msk.f32.mxu1 %vm95_vm1, %v10446_v4  ;;  %v10474_v5 = vld [vmem:[%s12391_s0 + $0x300] sm:$0xff]  ;;  %v10479_v4 = vld [vmem:[%s12391_s0 + $0x16a] sm:$0xff]  ;;  %12520 = vst [vmem:[#allocation63_spill] sm:$0xff] %v10497_v8 }
  0x77   :  { %8638 = vmatprep.mubr.msk.f32.mxu0 %vm95_vm1, %v10451_v30  ;;  %12517 = vst [vmem:[#allocation60_spill] sm:$0xff] %v10474_v5  ;;  %12518 = vst [vmem:[#allocation61_spill] sm:$0xff] %v10479_v4  ;;  %v10490_v30 = vld [vmem:[%s12391_s0 + $0x308] sm:$0xff] }
  0x78   :  { %12519 = vst [vmem:[#allocation62_spill] sm:$0xff] %v10490_v30 }
  0x79   :  { %8197 = vmatmul.mubr.msk.f32.gmra.mrb[58].mxu1 %vm95_vm1, %v10462_v7  ;;  %v7037_v7 = vld [vmem:[%s12391_s0 + $0x18a] sm:$0xff] }
  0x7a   :  { %8639 = vmatmul.mubr.msk.f32.gmra.mrb[26].mxu0 %vm95_vm1, %v10469_v10  ;;  %8199 = vmatprep.mubr.msk.f32.mxu1 %vm95_vm1, %v10474_v5  ;;  %v10502_v10 = vld [vmem:[%s12391_s0 + $0x318] sm:$0xff]  ;;  %v7036_v5 = vld [vmem:[%s12391_s0 + $0x182] sm:$0xff] }
  0x7b   :  { %8641 = vmatprep.mubr.msk.f32.mxu0 %vm95_vm1, %v10479_v4  ;;  %12521 = vst [vmem:[#allocation64_spill] sm:$0xff] %v10502_v10  ;;  %v10516_v4 = vld [vmem:[%s12391_s0 + $0x320] sm:$0xff] }
  0x7c   :  { %12522 = vst [vmem:[#allocation65_spill] sm:$0xff] %v10516_v4 }
  0x7d   :  { %8200 = vmatmul.mubr.msk.f32.gmra.mrb[60].mxu1 %vm95_vm1, %v10490_v30  ;;  %v741_v30 = vld [vmem:[%s12391_s0 + $0x1] sm:$0xff] }
  0x7e   :  { %8642 = vmatmul.mubr.msk.f32.gmra.mrb[28].mxu0 %vm95_vm1, %v10497_v8  ;;  %8202 = vmatprep.mubr.msk.f32.mxu1 %vm95_vm1, %v10502_v10  ;;  %v10528_v8 = vld [vmem:[%s12391_s0 + $0x1ca] sm:$0xff]  ;;  %v10542_v10 = vld [vmem:[%s12391_s0 + $0x1d2] sm:$0xff] }
  0x7f   :  { %8644 = vmatprep.mubr.msk.f32.mxu0 %vm95_vm1, %v7036_v5  ;;  %v742_v5 = vld [vmem:[%s12391_s0 + $0x9] sm:$0xff] }
  0x81   :  { %8203 = vmatmul.mubr.msk.f32.gmra.mrb[62].mxu1 %vm95_vm1, %v10516_v4  ;;  %v10547_v4 = vld [vmem:[%s12391_s0 + $0x1e2] sm:$0xff] }
  0x82   :  { %8645 = vmatmul.mubr.msk.f32.gmra.mrb[30].mxu0 %vm95_vm1, %v7037_v7  ;;  %8207 = vmatprep.mubr.msk.f32.mxu1 %vm95_vm1, %v741_v30  ;;  %v10553_v7 = vld [vmem:[%s12392_s1 + $0xc] sm:$0xf] }
  0x83   :  { %8647 = vmatprep.mubr.msk.f32.mxu0 %vm95_vm1, %v10528_v8  ;;  %v10566_v30 = vld [vmem:[%s12391_s0 + $0x1ea] sm:$0xff] }
  0x85   :  { %8208 = vmatmul.mubr.msk.f32.vlgmr.msra.gmra.mrb[0].mxu1 %vm95_vm1, %v742_v5  ;;  %v10571_v5 = vld [vmem:[%s12391_s0 + $0x1fa] sm:$0xff] }
  0x86   :  { %8648 = vmatmul.mubr.msk.f32.gmra.mrb[32].mxu0 %vm95_vm1, %v10542_v10  ;;  %8304 = vmatpush3.msk.msra.mxu1 %vm288_vm0, %v9965_v52  ;;  %v10591_v52 = vld [vmem:[%s12391_s0 + $0x212] sm:$0xff] }
  0x87   :  { %8210 = vmatprep.mubr.msk.f32.mxu1 %vm95_vm1, %v9635_v3  ;;  %8650 = vmatprep.mubr.msk.f32.mxu0 %vm95_vm1, %v10547_v4  ;;  %v10586_v3 = vld [vmem:[%s12391_s0 + $0x202] sm:$0xff] }
  0x88   :  { %8401 = vmatprep.subr.msk.mxu1 %vm288_vm0, %v10553_v7 }
  0x89   :  { %8211 = vmatmul.mubr.msk.f32.gmra.mrb[2].mxu1 %vm95_vm1, %v9648_v6  ;;  %v10604_v6 = vld [vmem:[%s12391_s0 + $0x21a] sm:$0xff] }
  0x8a   :  { %8651 = vmatmul.mubr.msk.f32.gmra.mrb[34].mxu0 %vm95_vm1, %v10566_v30  ;;  %8213 = vmatprep.mubr.msk.f32.mxu1 %vm95_vm1, %v9665_v9  ;;  %v10609_v9 = vld [vmem:[%s12391_s0 + $0x22a] sm:$0xff] }
  0x8b   :  { %8653 = vmatprep.mubr.msk.f32.mxu0 %vm95_vm1, %v10571_v5 }
  0x8d   :  { %8214 = vmatmul.mubr.msk.f32.gmra.mrb[4].mxu1 %vm95_vm1, %v9678_v11  ;;  %v10622_v11 = vld [vmem:[%s12391_s0 + $0x232] sm:$0xff] }
  0x8e   :  { %8654 = vmatmul.mubr.msk.f32.gmra.mrb[36].mxu0 %vm95_vm1, %v10586_v3  ;;  %8216 = vmatprep.mubr.msk.f32.mxu1 %vm95_vm1, %v9691_v13  ;;  %v10627_v13 = vld [vmem:[%s12391_s0 + $0x242] sm:$0xff] }
  0x8f   :  { %8656 = vmatprep.mubr.msk.f32.mxu0 %vm95_vm1, %v10591_v52 }
  0x91   :  { %8217 = vmatmul.mubr.msk.f32.gmra.mrb[6].mxu1 %vm95_vm1, %v9708_v15  ;;  %v10640_v15 = vld [vmem:[%s12391_s0 + $0x24a] sm:$0xff] }
  0x92   :  { %8657 = vmatmul.mubr.msk.f32.gmra.mrb[38].mxu0 %vm95_vm1, %v10604_v6  ;;  %8219 = vmatprep.mubr.msk.f32.mxu1 %vm95_vm1, %v9718_v17  ;;  %v10645_v17 = vld [vmem:[%s12391_s0 + $0x25a] sm:$0xff] }
  0x93   :  { %8659 = vmatprep.mubr.msk.f32.mxu0 %vm95_vm1, %v10609_v9 }
  0x95   :  { %8220 = vmatmul.mubr.msk.f32.gmra.mrb[8].mxu1 %vm95_vm1, %v9736_v19  ;;  %v10658_v19 = vld [vmem:[%s12391_s0 + $0x262] sm:$0xff] }
  0x96   :  { %8660 = vmatmul.mubr.msk.f32.gmra.mrb[40].mxu0 %vm95_vm1, %v10622_v11  ;;  %8222 = vmatprep.mubr.msk.f32.mxu1 %vm95_vm1, %v9746_v21  ;;  %v10663_v21 = vld [vmem:[%s12391_s0 + $0x272] sm:$0xff] }
  0x97   :  { %8662 = vmatprep.mubr.msk.f32.mxu0 %vm95_vm1, %v10627_v13 }
  0x99   :  { %8223 = vmatmul.mubr.msk.f32.gmra.mrb[10].mxu1 %vm95_vm1, %v9764_v23  ;;  %v10676_v23 = vld [vmem:[%s12391_s0 + $0x27a] sm:$0xff] }
  0x9a   :  { %8663 = vmatmul.mubr.msk.f32.gmra.mrb[42].mxu0 %vm95_vm1, %v10640_v15  ;;  %8225 = vmatprep.mubr.msk.f32.mxu1 %vm95_vm1, %v9774_v25  ;;  %v10681_v25 = vld [vmem:[%s12391_s0 + $0x28a] sm:$0xff] }
  0x9b   :  { %8665 = vmatprep.mubr.msk.f32.mxu0 %vm95_vm1, %v10645_v17 }
  0x9d   :  { %8226 = vmatmul.mubr.msk.f32.gmra.mrb[12].mxu1 %vm95_vm1, %v9792_v27  ;;  %v10694_v27 = vld [vmem:[%s12391_s0 + $0x292] sm:$0xff] }
  0x9e   :  { %8666 = vmatmul.mubr.msk.f32.gmra.mrb[44].mxu0 %vm95_vm1, %v10658_v19  ;;  %8228 = vmatprep.mubr.msk.f32.mxu1 %vm95_vm1, %v9802_v29  ;;  %v10699_v29 = vld [vmem:[%s12391_s0 + $0x2a2] sm:$0xff] }
  0x9f   :  { %8668 = vmatprep.mubr.msk.f32.mxu0 %vm95_vm1, %v10663_v21 }
  0xa1   :  { %8229 = vmatmul.mubr.msk.f32.gmra.mrb[14].mxu1 %vm95_vm1, %v9825_v32  ;;  %v10712_v32 = vld [vmem:[%s12391_s0 + $0x2aa] sm:$0xff] }
  0xa2   :  { %8669 = vmatmul.mubr.msk.f32.gmra.mrb[46].mxu0 %vm95_vm1, %v10676_v23  ;;  %8231 = vmatprep.mubr.msk.f32.mxu1 %vm95_vm1, %v9837_v34  ;;  %v10717_v34 = vld [vmem:[%s12391_s0 + $0x2ba] sm:$0xff] }
  0xa3   :  { %8671 = vmatprep.mubr.msk.f32.mxu0 %vm95_vm1, %v10681_v25 }
  0xa5   :  { %8232 = vmatmul.mubr.msk.f32.gmra.mrb[16].mxu1 %vm95_vm1, %v9855_v36  ;;  %v10730_v36 = vld [vmem:[%s12391_s0 + $0x2c2] sm:$0xff] }
  0xa6   :  { %8672 = vmatmul.mubr.msk.f32.gmra.mrb[48].mxu0 %vm95_vm1, %v10694_v27  ;;  %8234 = vmatprep.mubr.msk.f32.mxu1 %vm95_vm1, %v9865_v38  ;;  %v10735_v38 = vld [vmem:[%s12391_s0 + $0x2d2] sm:$0xff] }
  0xa7   :  { %8674 = vmatprep.mubr.msk.f32.mxu0 %vm95_vm1, %v10699_v29 }
  0xa9   :  { %8235 = vmatmul.mubr.msk.f32.gmra.mrb[18].mxu1 %vm95_vm1, %v9883_v40  ;;  %v10748_v40 = vld [vmem:[%s12391_s0 + $0x2da] sm:$0xff] }
  0xaa   :  { %8675 = vmatmul.mubr.msk.f32.gmra.mrb[50].mxu0 %vm95_vm1, %v10712_v32  ;;  %8237 = vmatprep.mubr.msk.f32.mxu1 %vm95_vm1, %v9893_v42  ;;  %v10753_v42 = vld [vmem:[%s12391_s0 + $0x2ea] sm:$0xff] }
  0xab   :  { %8677 = vmatprep.mubr.msk.f32.mxu0 %vm95_vm1, %v10717_v34 }
  0xad   :  { %8238 = vmatmul.mubr.msk.f32.gmra.mrb[20].mxu1 %vm95_vm1, %v9911_v44  ;;  %v10766_v44 = vld [vmem:[%s12391_s0 + $0x2f2] sm:$0xff] }
  0xae   :  { %8678 = vmatmul.mubr.msk.f32.gmra.mrb[52].mxu0 %vm95_vm1, %v10730_v36  ;;  %8240 = vmatprep.mubr.msk.f32.mxu1 %vm95_vm1, %v9921_v46  ;;  %v10771_v46 = vld [vmem:[%s12391_s0 + $0x302] sm:$0xff] }
  0xaf   :  { %8680 = vmatprep.mubr.msk.f32.mxu0 %vm95_vm1, %v10735_v38 }
  0xb1   :  { %8241 = vmatmul.mubr.msk.f32.gmra.mrb[22].mxu1 %vm95_vm1, %v9939_v48  ;;  %v10784_v48 = vld [vmem:[%s12391_s0 + $0x30a] sm:$0xff] }
  0xb2   :  { %8681 = vmatmul.mubr.msk.f32.gmra.mrb[54].mxu0 %vm95_vm1, %v10748_v40  ;;  %8243 = vmatprep.mubr.msk.f32.mxu1 %vm95_vm1, %v9949_v50  ;;  %v10789_v50 = vld [vmem:[%s12391_s0 + $0x31a] sm:$0xff] }
  0xb3   :  { %8683 = vmatprep.mubr.msk.f32.mxu0 %vm95_vm1, %v10753_v42 }
  0xb5   :  { %8244 = vmatmul.mubr.msk.f32.gmra.mrb[24].mxu1 %vm95_vm1, %v9972_v53  ;;  %v10802_v53 = vld [vmem:[%s12391_s0 + $0x322] sm:$0xff] }
  0xb6   :  { %8684 = vmatmul.mubr.msk.f32.gmra.mrb[56].mxu0 %vm95_vm1, %v10766_v44  ;;  %8246 = vmatprep.mubr.msk.f32.mxu1 %vm95_vm1, %v9984_v55  ;;  %v7068_v55 = vld [vmem:[%s12391_s0 + $0x332] sm:$0xff] }
  0xb7   :  { %8686 = vmatprep.mubr.msk.f32.mxu0 %vm95_vm1, %v10771_v46 }
  0xb9   :  { %8247 = vmatmul.mubr.msk.f32.gmra.mrb[26].mxu1 %vm95_vm1, %v10002_v57  ;;  %v7069_v57 = vld [vmem:[%s12391_s0 + $0x33a] sm:$0xff] }
  0xba   :  { %8687 = vmatmul.mubr.msk.f32.gmra.mrb[58].mxu0 %vm95_vm1, %v10784_v48  ;;  %8249 = vmatprep.mubr.msk.f32.mxu1 %vm95_vm1, %v10012_v59  ;;  %v773_v59 = vld [vmem:[%s12391_s0 + $0x1b1] sm:$0xff] }
  0xbb   :  { %8689 = vmatprep.mubr.msk.f32.mxu0 %vm95_vm1, %v10789_v50 }
  0xbd   :  { %8250 = vmatmul.mubr.msk.f32.gmra.mrb[28].mxu1 %vm95_vm1, %v10030_v61  ;;  %v774_v61 = vld [vmem:[%s12391_s0 + $0x1b9] sm:$0xff] }
  0xbe   :  { %8690 = vmatmul.mubr.msk.f32.gmra.mrb[60].mxu0 %vm95_vm1, %v10802_v53  ;;  %8252 = vmatprep.mubr.msk.f32.mxu1 %vm95_vm1, %v10040_v63  ;;  %v775_v63 = vld [vmem:[%s12391_s0 + $0x1c9] sm:$0xff] }
  0xbf   :  { %8692 = vmatprep.mubr.msk.f32.mxu0 %vm95_vm1, %v7068_v55  ;;  %v10842_v55 = vld [vmem:[%s12392_s1 + $0x20] sm:$0xf] }
  0xc1   :  { %8253 = vmatmul.mubr.msk.f32.gmra.mrb[30].mxu1 %vm95_vm1, %v10058_v2  ;;  %v776_v2 = vld [vmem:[%s12391_s0 + $0x1d1] sm:$0xff] }
  0xc2   :  { %8693 = vmatmul.mubr.msk.f32.gmra.mrb[62].mxu0 %vm95_vm1, %v7069_v57  ;;  %8255 = vmatprep.mubr.msk.f32.mxu1 %vm95_vm1, %v773_v59  ;;  %v12525_v57 = vld [vmem:[#allocation7_spill] sm:$0xff] }
  0xc3   :  { %8697 = vmatprep.mubr.msk.f32.mxu0 %vm95_vm1, %v9683_v12  ;;  %v10851_v12 = vld [vmem:[%s12391_s0 + $0x1e1] sm:$0xff]  ;;  %v11084_v59 = vld [vmem:[%s12391_s0 + $0x309] sm:$0xff] }
  0xc4   :  { %12526 = vst [vmem:[#allocation7_spill] sm:$0xff] %v11084_v59 }
  0xc5   :  { %8256 = vmatmul.mubr.msk.f32.gmra.mrb[32].mxu1 %vm95_vm1, %v774_v61  ;;  %v11091_v61 = vld [vmem:[%s12391_s0 + $0x188] sm:$0xff] }
  0xc6   :  { %8698 = vmatmul.mubr.msk.f32.vlgmr.msra.gmra.mrb[0].mxu0 %vm95_vm1, %v9701_v14  ;;  %8258 = vmatprep.mubr.msk.f32.mxu1 %vm95_vm1, %v775_v63  ;;  %v10870_v14 = vld [vmem:[%s12391_s0 + $0x1f9] sm:$0xff]  ;;  %12527 = vst [vmem:[#allocation66_spill] sm:$0xff] %v11091_v61 }
  0xc7   :  { %8700 = vmatprep.mubr.msk.f32.mxu0 %vm95_vm1, %v9713_v16  ;;  %8794 = vmatpush3.msk.msra.mxu0 %vm288_vm0, %v10123_v1  ;;  %v10863_v1 = vld [vmem:[%s12391_s0 + $0x1e9] sm:$0xff]  ;;  %v10881_v16 = vld [vmem:[%s12391_s0 + $0x201] sm:$0xff]  ;;  %v11096_v63 = vld [vmem:[%s12391_s0 + $0x319] sm:$0xff] }
  0xc8   :  { %8891 = vmatprep.subr.msk.mxu0 %vm288_vm0, %v10842_v55  ;;  %12528 = vst [vmem:[#allocation67_spill] sm:$0xff] %v11096_v63 }
  0xc9   :  { %8259 = vmatmul.mubr.msk.f32.gmra.mrb[34].mxu1 %vm95_vm1, %v776_v2  ;;  %v7165_v2 = vld [vmem:[%s12391_s0 + $0x198] sm:$0xff] }
  0xca   :  { %8701 = vmatmul.mubr.msk.f32.gmra.mrb[2].mxu0 %vm95_vm1, %v9729_v18  ;;  %8261 = vmatprep.mubr.msk.f32.mxu1 %vm95_vm1, %v10851_v12  ;;  %v10888_v18 = vld [vmem:[%s12391_s0 + $0x211] sm:$0xff] }
  0xcb   :  { %8703 = vmatprep.mubr.msk.f32.mxu0 %vm95_vm1, %v9741_v20  ;;  %v10899_v20 = vld [vmem:[%s12391_s0 + $0x219] sm:$0xff] }
  0xcd   :  { %8262 = vmatmul.mubr.msk.f32.gmra.mrb[36].mxu1 %vm95_vm1, %v10863_v1 }
  0xce   :  { %8704 = vmatmul.mubr.msk.f32.gmra.mrb[4].mxu0 %vm95_vm1, %v9757_v22  ;;  %8264 = vmatprep.mubr.msk.f32.mxu1 %vm95_vm1, %v10870_v14  ;;  %v10906_v22 = vld [vmem:[%s12391_s0 + $0x229] sm:$0xff] }
  0xcf   :  { %8706 = vmatprep.mubr.msk.f32.mxu0 %vm95_vm1, %v9769_v24  ;;  %v10917_v24 = vld [vmem:[%s12391_s0 + $0x231] sm:$0xff] }
  0xd1   :  { %8265 = vmatmul.mubr.msk.f32.gmra.mrb[38].mxu1 %vm95_vm1, %v10881_v16 }
  0xd2   :  { %8707 = vmatmul.mubr.msk.f32.gmra.mrb[6].mxu0 %vm95_vm1, %v9785_v26  ;;  %8267 = vmatprep.mubr.msk.f32.mxu1 %vm95_vm1, %v10888_v18  ;;  %v10924_v26 = vld [vmem:[%s12391_s0 + $0x241] sm:$0xff] }
  0xd3   :  { %8709 = vmatprep.mubr.msk.f32.mxu0 %vm95_vm1, %v9797_v28  ;;  %v10935_v28 = vld [vmem:[%s12391_s0 + $0x249] sm:$0xff] }
  0xd5   :  { %8268 = vmatmul.mubr.msk.f32.gmra.mrb[40].mxu1 %vm95_vm1, %v10899_v20 }
  0xd6   :  { %8710 = vmatmul.mubr.msk.f32.gmra.mrb[8].mxu0 %vm95_vm1, %v9818_v31  ;;  %8270 = vmatprep.mubr.msk.f32.mxu1 %vm95_vm1, %v10906_v22  ;;  %v10942_v31 = vld [vmem:[%s12391_s0 + $0x259] sm:$0xff] }
  0xd7   :  { %8712 = vmatprep.mubr.msk.f32.mxu0 %vm95_vm1, %v9830_v33  ;;  %v10953_v33 = vld [vmem:[%s12391_s0 + $0x261] sm:$0xff] }
  0xd9   :  { %8271 = vmatmul.mubr.msk.f32.gmra.mrb[42].mxu1 %vm95_vm1, %v10917_v24 }
  0xda   :  { %8713 = vmatmul.mubr.msk.f32.gmra.mrb[10].mxu0 %vm95_vm1, %v9848_v35  ;;  %8273 = vmatprep.mubr.msk.f32.mxu1 %vm95_vm1, %v10924_v26  ;;  %v10960_v35 = vld [vmem:[%s12391_s0 + $0x271] sm:$0xff] }
  0xdb   :  { %8715 = vmatprep.mubr.msk.f32.mxu0 %vm95_vm1, %v9860_v37  ;;  %v10971_v37 = vld [vmem:[%s12391_s0 + $0x279] sm:$0xff] }
  0xdd   :  { %8274 = vmatmul.mubr.msk.f32.gmra.mrb[44].mxu1 %vm95_vm1, %v10935_v28 }
  0xde   :  { %8716 = vmatmul.mubr.msk.f32.gmra.mrb[12].mxu0 %vm95_vm1, %v9876_v39  ;;  %8276 = vmatprep.mubr.msk.f32.mxu1 %vm95_vm1, %v10942_v31  ;;  %v10978_v39 = vld [vmem:[%s12391_s0 + $0x289] sm:$0xff] }
  0xdf   :  { %8718 = vmatprep.mubr.msk.f32.mxu0 %vm95_vm1, %v9888_v41  ;;  %v10989_v41 = vld [vmem:[%s12391_s0 + $0x291] sm:$0xff] }
  0xe1   :  { %8277 = vmatmul.mubr.msk.f32.gmra.mrb[46].mxu1 %vm95_vm1, %v10953_v33 }
  0xe2   :  { %8719 = vmatmul.mubr.msk.f32.gmra.mrb[14].mxu0 %vm95_vm1, %v9904_v43  ;;  %8279 = vmatprep.mubr.msk.f32.mxu1 %vm95_vm1, %v10960_v35  ;;  %v10996_v43 = vld [vmem:[%s12391_s0 + $0x2a1] sm:$0xff] }
  0xe3   :  { %8721 = vmatprep.mubr.msk.f32.mxu0 %vm95_vm1, %v9916_v45  ;;  %v11007_v45 = vld [vmem:[%s12391_s0 + $0x2a9] sm:$0xff] }
  0xe5   :  { %8280 = vmatmul.mubr.msk.f32.gmra.mrb[48].mxu1 %vm95_vm1, %v10971_v37 }
  0xe6   :  { %8722 = vmatmul.mubr.msk.f32.gmra.mrb[16].mxu0 %vm95_vm1, %v9932_v47  ;;  %8282 = vmatprep.mubr.msk.f32.mxu1 %vm95_vm1, %v10978_v39  ;;  %v11014_v47 = vld [vmem:[%s12391_s0 + $0x2b9] sm:$0xff] }
  0xe7   :  { %8724 = vmatprep.mubr.msk.f32.mxu0 %vm95_vm1, %v9944_v49  ;;  %v11025_v49 = vld [vmem:[%s12391_s0 + $0x2c1] sm:$0xff] }
  0xe9   :  { %8283 = vmatmul.mubr.msk.f32.gmra.mrb[50].mxu1 %vm95_vm1, %v10989_v41 }
  0xea   :  { %8725 = vmatmul.mubr.msk.f32.gmra.mrb[18].mxu0 %vm95_vm1, %v9960_v51  ;;  %8285 = vmatprep.mubr.msk.f32.mxu1 %vm95_vm1, %v10996_v43  ;;  %v11032_v51 = vld [vmem:[%s12391_s0 + $0x2d1] sm:$0xff] }
  0xeb   :  { %8727 = vmatprep.mubr.msk.f32.mxu0 %vm95_vm1, %v9977_v54  ;;  %v11043_v54 = vld [vmem:[%s12391_s0 + $0x2d9] sm:$0xff] }
  0xed   :  { %8286 = vmatmul.mubr.msk.f32.gmra.mrb[52].mxu1 %vm95_vm1, %v11007_v45 }
  0xee   :  { %8728 = vmatmul.mubr.msk.f32.gmra.mrb[20].mxu0 %vm95_vm1, %v9995_v56  ;;  %8288 = vmatprep.mubr.msk.f32.mxu1 %vm95_vm1, %v11014_v47  ;;  %v11050_v56 = vld [vmem:[%s12391_s0 + $0x2e9] sm:$0xff] }
  0xef   :  { %8730 = vmatprep.mubr.msk.f32.mxu0 %vm95_vm1, %v10007_v58  ;;  %v11061_v58 = vld [vmem:[%s12391_s0 + $0x2f1] sm:$0xff] }
  0xf1   :  { %8289 = vmatmul.mubr.msk.f32.gmra.mrb[54].mxu1 %vm95_vm1, %v11025_v49 }
  0xf2   :  { %8731 = vmatmul.mubr.msk.f32.gmra.mrb[22].mxu0 %vm95_vm1, %v10023_v60  ;;  %8291 = vmatprep.mubr.msk.f32.mxu1 %vm95_vm1, %v11032_v51  ;;  %v12523_v60 = vld [vmem:[#allocation6_spill] sm:$0xff] }
  0xf3   :  { %8733 = vmatprep.mubr.msk.f32.mxu0 %vm95_vm1, %v10035_v62  ;;  %v11068_v62 = vld [vmem:[%s12391_s0 + $0x301] sm:$0xff] }
  0xf5   :  { %8292 = vmatmul.mubr.msk.f32.gmra.mrb[56].mxu1 %vm95_vm1, %v11043_v54 }
  0xf6   :  { %8734 = vmatmul.mubr.msk.f32.gmra.mrb[24].mxu0 %vm95_vm1, %v10051_v0  ;;  %8294 = vmatprep.mubr.msk.f32.mxu1 %vm95_vm1, %v11050_v56  ;;  %v11073_v0 = vld [vmem:[%s12391_s0 + $0x180] sm:$0xff] }
  0xf7   :  { %8736 = vmatprep.mubr.msk.f32.mxu0 %vm95_vm1, %v12523_v60  ;;  %12524 = vst [vmem:[#allocation6_spill] sm:$0xff] %v11073_v0  ;;  %v11110_v60 = vld [vmem:[%s12391_s0 + $0x321] sm:$0xff] }
  0xf8   :  { %12529 = vst [vmem:[#allocation68_spill] sm:$0xff] %v11110_v60 }
  0xf9   :  { %8295 = vmatmul.mubr.msk.f32.gmra.mrb[58].mxu1 %vm95_vm1, %v11061_v58 }
  0xfa   :  { %8737 = vmatmul.mubr.msk.f32.gmra.mrb[26].mxu0 %vm95_vm1, %v12525_v57  ;;  %8297 = vmatprep.mubr.msk.f32.mxu1 %vm95_vm1, %v11068_v62  ;;  %v7166_v57 = vld [vmem:[%s12391_s0 + $0x1a0] sm:$0xff] }
  0xfb   :  { %8739 = vmatprep.mubr.msk.f32.mxu0 %vm95_vm1, %v11073_v0  ;;  %v1449_v0 = vld [vmem:[%s12391_s0 + $0x2] sm:$0xff] }
  0xfd   :  { %8298 = vmatmul.mubr.msk.f32.gmra.mrb[60].mxu1 %vm95_vm1, %v11084_v59  ;;  %v12535_v59 = vld [vmem:[#allocation9_spill] sm:$0xff] }
  0xfe   :  { %8740 = vmatmul.mubr.msk.f32.gmra.mrb[28].mxu0 %vm95_vm1, %v11091_v61  ;;  %8300 = vmatprep.mubr.msk.f32.mxu1 %vm95_vm1, %v11096_v63  ;;  %v1450_v61 = vld [vmem:[%s12391_s0 + $0xa] sm:$0xff] }
  0xff   :  { %8742 = vmatprep.mubr.msk.f32.mxu0 %vm95_vm1, %v7165_v2  ;;  %v12530_v2 = vld [vmem:[#allocation12_spill] sm:$0xff]  ;;  %v12531_v63 = vld [vmem:[#allocation14_spill] sm:$0xff] }
 0x101   :  { %8301 = vmatmul.mubr.msk.f32.gmra.mrb[62].mxu1 %vm95_vm1, %v11110_v60  ;;  %v12532_v60 = vld [vmem:[#allocation8_spill] sm:$0xff] }
 0x102   :  { %8743 = vmatmul.mubr.msk.f32.gmra.mrb[30].mxu0 %vm95_vm1, %v7166_v57  ;;  %8305 = vmatprep.mubr.msk.f32.mxu1 %vm95_vm1, %v1449_v0  ;;  %v12533_v57 = vld [vmem:[#allocation16_spill] sm:$0xff]  ;;  %v12534_v0 = vld [vmem:[#allocation5_spill] sm:$0xff] }
 0x103   :  { %8745 = vmatprep.mubr.msk.f32.mxu0 %vm95_vm1, %v12530_v2  ;;  %v12536_v2 = vld [vmem:[#allocation18_spill] sm:$0xff] }
 0x105   :  { %8306 = vmatmul.mubr.msk.f32.vlgmr.msra.gmra.mrb[0].mxu1 %vm95_vm1, %v1450_v61  ;;  %v12537_v61 = vld [vmem:[#allocation10_spill] sm:$0xff] }
 0x106   :  { %8746 = vmatmul.mubr.msk.f32.gmra.mrb[32].mxu0 %vm95_vm1, %v12531_v63  ;;  %8402 = vmatpush3.msk.msra.mxu1 %vm288_vm0, %v10553_v7  ;;  %v12538_v63 = vld [vmem:[#allocation20_spill] sm:$0xff]  ;;  %v12539_v7 = vld [vmem:[#allocation11_spill] sm:$0xff] }
 0x107   :  { %8308 = vmatprep.mubr.msk.f32.mxu1 %vm95_vm1, %v12532_v60  ;;  %8748 = vmatprep.mubr.msk.f32.mxu0 %vm95_vm1, %v12533_v57  ;;  %v12540_v60 = vld [vmem:[#allocation22_spill] sm:$0xff]  ;;  %v12541_v57 = vld [vmem:[#allocation13_spill] sm:$0xff] }
 0x108   :  { %8989 = vmatprep.subr.msk.mxu1 %vm288_vm0, %v12534_v0  ;;  %v12542_v0 = vld [vmem:[#allocation24_spill] sm:$0xff] }
 0x109   :  { %8309 = vmatmul.mubr.msk.f32.gmra.mrb[2].mxu1 %vm95_vm1, %v12535_v59  ;;  %v12543_v59 = vld [vmem:[#allocation15_spill] sm:$0xff] }
 0x10a   :  { %8749 = vmatmul.mubr.msk.f32.gmra.mrb[34].mxu0 %vm95_vm1, %v12536_v2  ;;  %8311 = vmatprep.mubr.msk.f32.mxu1 %vm95_vm1, %v12537_v61  ;;  %v12544_v2 = vld [vmem:[#allocation26_spill] sm:$0xff]  ;;  %v12545_v61 = vld [vmem:[#allocation17_spill] sm:$0xff] }
 0x10b   :  { %8751 = vmatprep.mubr.msk.f32.mxu0 %vm95_vm1, %v12538_v63  ;;  %v12546_v63 = vld [vmem:[#allocation28_spill] sm:$0xff] }
 0x10d   :  { %8312 = vmatmul.mubr.msk.f32.gmra.mrb[4].mxu1 %vm95_vm1, %v12539_v7  ;;  %v12547_v7 = vld [vmem:[#allocation19_spill] sm:$0xff] }
 0x10e   :  { %8752 = vmatmul.mubr.msk.f32.gmra.mrb[36].mxu0 %vm95_vm1, %v12540_v60  ;;  %8314 = vmatprep.mubr.msk.f32.mxu1 %vm95_vm1, %v12541_v57  ;;  %v12548_v60 = vld [vmem:[#allocation30_spill] sm:$0xff]  ;;  %v12549_v57 = vld [vmem:[#allocation21_spill] sm:$0xff] }
 0x10f   :  { %8754 = vmatprep.mubr.msk.f32.mxu0 %vm95_vm1, %v12542_v0  ;;  %v12550_v0 = vld [vmem:[#allocation32_spill] sm:$0xff] }
 0x111   :  { %8315 = vmatmul.mubr.msk.f32.gmra.mrb[6].mxu1 %vm95_vm1, %v12543_v59  ;;  %v12551_v59 = vld [vmem:[#allocation23_spill] sm:$0xff] }
 0x112   :  { %8755 = vmatmul.mubr.msk.f32.gmra.mrb[38].mxu0 %vm95_vm1, %v12544_v2  ;;  %8317 = vmatprep.mubr.msk.f32.mxu1 %vm95_vm1, %v12545_v61  ;;  %v12552_v2 = vld [vmem:[#allocation34_spill] sm:$0xff]  ;;  %v12553_v61 = vld [vmem:[#allocation25_spill] sm:$0xff] }
 0x113   :  { %8757 = vmatprep.mubr.msk.f32.mxu0 %vm95_vm1, %v12546_v63  ;;  %v12554_v63 = vld [vmem:[#allocation36_spill] sm:$0xff] }
 0x115   :  { %8318 = vmatmul.mubr.msk.f32.gmra.mrb[8].mxu1 %vm95_vm1, %v12547_v7  ;;  %v12555_v7 = vld [vmem:[#allocation27_spill] sm:$0xff] }
 0x116   :  { %8758 = vmatmul.mubr.msk.f32.gmra.mrb[40].mxu0 %vm95_vm1, %v12548_v60  ;;  %8320 = vmatprep.mubr.msk.f32.mxu1 %vm95_vm1, %v12549_v57  ;;  %v12556_v60 = vld [vmem:[#allocation38_spill] sm:$0xff]  ;;  %v12557_v57 = vld [vmem:[#allocation29_spill] sm:$0xff] }
 0x117   :  { %8760 = vmatprep.mubr.msk.f32.mxu0 %vm95_vm1, %v12550_v0  ;;  %v12558_v0 = vld [vmem:[#allocation40_spill] sm:$0xff] }
 0x119   :  { %8321 = vmatmul.mubr.msk.f32.gmra.mrb[10].mxu1 %vm95_vm1, %v12551_v59  ;;  %v12559_v59 = vld [vmem:[#allocation31_spill] sm:$0xff] }
 0x11a   :  { %8761 = vmatmul.mubr.msk.f32.gmra.mrb[42].mxu0 %vm95_vm1, %v12552_v2  ;;  %8323 = vmatprep.mubr.msk.f32.mxu1 %vm95_vm1, %v12553_v61  ;;  %v12560_v2 = vld [vmem:[#allocation42_spill] sm:$0xff]  ;;  %v12561_v61 = vld [vmem:[#allocation33_spill] sm:$0xff] }
 0x11b   :  { %8763 = vmatprep.mubr.msk.f32.mxu0 %vm95_vm1, %v12554_v63  ;;  %v12562_v63 = vld [vmem:[#allocation44_spill] sm:$0xff] }
 0x11d   :  { %8324 = vmatmul.mubr.msk.f32.gmra.mrb[12].mxu1 %vm95_vm1, %v12555_v7  ;;  %v12563_v7 = vld [vmem:[#allocation35_spill] sm:$0xff] }
 0x11e   :  { %8764 = vmatmul.mubr.msk.f32.gmra.mrb[44].mxu0 %vm95_vm1, %v12556_v60  ;;  %8326 = vmatprep.mubr.msk.f32.mxu1 %vm95_vm1, %v12557_v57  ;;  %v12564_v60 = vld [vmem:[#allocation46_spill] sm:$0xff]  ;;  %v12565_v57 = vld [vmem:[#allocation37_spill] sm:$0xff] }
 0x11f   :  { %8766 = vmatprep.mubr.msk.f32.mxu0 %vm95_vm1, %v12558_v0  ;;  %v12566_v0 = vld [vmem:[#allocation48_spill] sm:$0xff] }
 0x121   :  { %8327 = vmatmul.mubr.msk.f32.gmra.mrb[14].mxu1 %vm95_vm1, %v12559_v59  ;;  %v12567_v59 = vld [vmem:[#allocation39_spill] sm:$0xff] }
 0x122   :  { %8767 = vmatmul.mubr.msk.f32.gmra.mrb[46].mxu0 %vm95_vm1, %v12560_v2  ;;  %8329 = vmatprep.mubr.msk.f32.mxu1 %vm95_vm1, %v12561_v61  ;;  %v12568_v2 = vld [vmem:[#allocation50_spill] sm:$0xff]  ;;  %v12569_v61 = vld [vmem:[#allocation41_spill] sm:$0xff] }
 0x123   :  { %8769 = vmatprep.mubr.msk.f32.mxu0 %vm95_vm1, %v12562_v63  ;;  %v12570_v63 = vld [vmem:[#allocation52_spill] sm:$0xff] }
 0x125   :  { %8330 = vmatmul.mubr.msk.f32.gmra.mrb[16].mxu1 %vm95_vm1, %v12563_v7  ;;  %v12571_v7 = vld [vmem:[#allocation43_spill] sm:$0xff] }
 0x126   :  { %8770 = vmatmul.mubr.msk.f32.gmra.mrb[48].mxu0 %vm95_vm1, %v12564_v60  ;;  %8332 = vmatprep.mubr.msk.f32.mxu1 %vm95_vm1, %v12565_v57  ;;  %v12572_v60 = vld [vmem:[#allocation54_spill] sm:$0xff]  ;;  %v12573_v57 = vld [vmem:[#allocation45_spill] sm:$0xff] }
 0x127   :  { %8772 = vmatprep.mubr.msk.f32.mxu0 %vm95_vm1, %v12566_v0  ;;  %v12574_v0 = vld [vmem:[#allocation56_spill] sm:$0xff] }
 0x129   :  { %8333 = vmatmul.mubr.msk.f32.gmra.mrb[18].mxu1 %vm95_vm1, %v12567_v59  ;;  %v12575_v59 = vld [vmem:[#allocation47_spill] sm:$0xff] }
 0x12a   :  { %8773 = vmatmul.mubr.msk.f32.gmra.mrb[50].mxu0 %vm95_vm1, %v12568_v2  ;;  %8335 = vmatprep.mubr.msk.f32.mxu1 %vm95_vm1, %v12569_v61  ;;  %v12576_v2 = vld [vmem:[#allocation58_spill] sm:$0xff]  ;;  %v12577_v61 = vld [vmem:[#allocation49_spill] sm:$0xff] }
 0x12b   :  { %8775 = vmatprep.mubr.msk.f32.mxu0 %vm95_vm1, %v12570_v63  ;;  %v12578_v63 = vld [vmem:[#allocation60_spill] sm:$0xff] }
 0x12d   :  { %8336 = vmatmul.mubr.msk.f32.gmra.mrb[20].mxu1 %vm95_vm1, %v12571_v7  ;;  %v12579_v7 = vld [vmem:[#allocation51_spill] sm:$0xff] }
 0x12e   :  { %8776 = vmatmul.mubr.msk.f32.gmra.mrb[52].mxu0 %vm95_vm1, %v12572_v60  ;;  %8338 = vmatprep.mubr.msk.f32.mxu1 %vm95_vm1, %v12573_v57  ;;  %v12580_v60 = vld [vmem:[#allocation62_spill] sm:$0xff]  ;;  %v12581_v57 = vld [vmem:[#allocation53_spill] sm:$0xff] }
 0x12f   :  { %8778 = vmatprep.mubr.msk.f32.mxu0 %vm95_vm1, %v12574_v0  ;;  %v12582_v0 = vld [vmem:[#allocation64_spill] sm:$0xff] }
 0x131   :  { %8339 = vmatmul.mubr.msk.f32.gmra.mrb[22].mxu1 %vm95_vm1, %v12575_v59  ;;  %v11238_v59 = vld [vmem:[%s12391_s0 + $0x330] sm:$0xff] }
 0x132   :  { %8779 = vmatmul.mubr.msk.f32.gmra.mrb[54].mxu0 %vm95_vm1, %v12576_v2  ;;  %8341 = vmatprep.mubr.msk.f32.mxu1 %vm95_vm1, %v12577_v61  ;;  %v12583_v2 = vld [vmem:[#allocation55_spill] sm:$0xff]  ;;  %v12584_v61 = vld [vmem:[#allocation65_spill] sm:$0xff] }
 0x133   :  { %8781 = vmatprep.mubr.msk.f32.mxu0 %vm95_vm1, %v12578_v63  ;;  %v12585_v63 = vld [vmem:[#allocation57_spill] sm:$0xff] }
 0x135   :  { %8342 = vmatmul.mubr.msk.f32.gmra.mrb[24].mxu1 %vm95_vm1, %v12579_v7  ;;  %v11251_v7 = vld [vmem:[%s12391_s0 + $0x338] sm:$0xff] }
 0x136   :  { %8782 = vmatmul.mubr.msk.f32.gmra.mrb[56].mxu0 %vm95_vm1, %v12580_v60  ;;  %8344 = vmatprep.mubr.msk.f32.mxu1 %vm95_vm1, %v12581_v57  ;;  %12586 = vst [vmem:[#allocation12_spill] sm:$0xff] %v11251_v7  ;;  %v7197_v60 = vld [vmem:[%s12391_s0 + $0x348] sm:$0xff]  ;;  %v12587_v57 = vld [vmem:[#allocation59_spill] sm:$0xff] }
 0x137   :  { %8784 = vmatprep.mubr.msk.f32.mxu0 %vm95_vm1, %v12582_v0  ;;  %v12588_v0 = vld [vmem:[#allocation61_spill] sm:$0xff] }
 0x139   :  { %8345 = vmatmul.mubr.msk.f32.gmra.mrb[26].mxu1 %vm95_vm1, %v12583_v2  ;;  %v7198_v2 = vld [vmem:[%s12391_s0 + $0x350] sm:$0xff] }
 0x13a   :  { %8785 = vmatmul.mubr.msk.f32.gmra.mrb[58].mxu0 %vm95_vm1, %v12584_v61  ;;  %8347 = vmatprep.mubr.msk.f32.mxu1 %vm95_vm1, %v12585_v63  ;;  %v1481_v61 = vld [vmem:[%s12391_s0 + $0x1b2] sm:$0xff] }
 0x13b   :  { %8787 = vmatprep.mubr.msk.f32.mxu0 %vm95_vm1, %v11238_v59  ;;  %v7264_v63 = vld [vmem:[%s12391_s0 + $0x31] sm:$0xff] }
 0x13d   :  { %8348 = vmatmul.mubr.msk.f32.gmra.mrb[28].mxu1 %vm95_vm1, %v12587_v57  ;;  %v12589_v57 = vld [vmem:[#allocation63_spill] sm:$0xff] }
 0x13e   :  { %8788 = vmatmul.mubr.msk.f32.gmra.mrb[60].mxu0 %vm95_vm1, %v11251_v7  ;;  %8350 = vmatprep.mubr.msk.f32.mxu1 %vm95_vm1, %v12588_v0  ;;  %v7265_v0 = vld [vmem:[%s12391_s0 + $0x39] sm:$0xff]  ;;  %v7266_v7 = vld [vmem:[%s12391_s0 + $0x49] sm:$0xff] }
 0x13f   :  { %8790 = vmatprep.mubr.msk.f32.mxu0 %vm95_vm1, %v7197_v60  ;;  %v1482_v60 = vld [vmem:[%s12391_s0 + $0x1ba] sm:$0xff] }
 0x141   :  { %8351 = vmatmul.mubr.msk.f32.gmra.mrb[30].mxu1 %vm95_vm1, %v12589_v57  ;;  %v12591_v57 = vld [vmem:[#allocation67_spill] sm:$0xff] }
 0x142   :  { %8791 = vmatmul.mubr.msk.f32.gmra.mrb[62].mxu0 %vm95_vm1, %v7198_v2  ;;  %8353 = vmatprep.mubr.msk.f32.mxu1 %vm95_vm1, %v1481_v61  ;;  %v7267_v2 = vld [vmem:[%s12391_s0 + $0x51] sm:$0xff]  ;;  %v7268_v61 = vld [vmem:[%s12391_s0 + $0x61] sm:$0xff] }
 0x143   :  { %8795 = vmatprep.mubr.msk.f32.mxu0 %vm95_vm1, %v7264_v63  ;;  %v12590_v63 = vld [vmem:[#allocation7_spill] sm:$0xff] }
 0x145   :  { %8354 = vmatmul.mubr.msk.f32.gmra.mrb[32].mxu1 %vm95_vm1, %v1482_v60  ;;  %v11642_v60 = vld [vmem:[%s12391_s0 + $0x331] sm:$0xff] }
 0x146   :  { %8796 = vmatmul.mubr.msk.f32.vlgmr.msra.gmra.mrb[0].mxu0 %vm95_vm1, %v7265_v0  ;;  %8356 = vmatprep.mubr.msk.f32.mxu1 %vm95_vm1, %v10528_v8  ;;  %v7269_v8 = vld [vmem:[%s12391_s0 + $0x69] sm:$0xff]  ;;  %v12592_v0 = vld [vmem:[#allocation68_spill] sm:$0xff] }
 0x147   :  { %8798 = vmatprep.mubr.msk.f32.mxu0 %vm95_vm1, %v7266_v7  ;;  %8892 = vmatpush3.msk.msra.mxu0 %vm288_vm0, %v10842_v55  ;;  %v7270_v55 = vld [vmem:[%s12391_s0 + $0x79] sm:$0xff] }
 0x148   :  { %v6751_v7 = vld [vmem:[%s12391_s0 + $0x38] sm:$0xff] }
 0x149   :  { %8357 = vmatmul.mubr.msk.f32.gmra.mrb[34].mxu1 %vm95_vm1, %v10542_v10  ;;  %v7272_v10 = vld [vmem:[%s12391_s0 + $0x91] sm:$0xff] }
 0x14a   :  { %8799 = vmatmul.mubr.msk.f32.gmra.mrb[2].mxu0 %vm95_vm1, %v7267_v2  ;;  %8359 = vmatprep.mubr.msk.f32.mxu1 %vm95_vm1, %v10547_v4  ;;  %v7271_v4 = vld [vmem:[%s12391_s0 + $0x81] sm:$0xff]  ;;  %v6777_v2 = vld [vmem:[%s12391_s0 + $0x170] sm:$0xff] }
 0x14b   :  { %8801 = vmatprep.mubr.msk.f32.mxu0 %vm95_vm1, %v7268_v61  ;;  %v11656_v61 = vld [vmem:[%s12391_s0 + $0x339] sm:$0xff] }
 0x14d   :  { %8360 = vmatmul.mubr.msk.f32.gmra.mrb[36].mxu1 %vm95_vm1, %v10566_v30  ;;  %v7273_v30 = vld [vmem:[%s12391_s0 + $0x99] sm:$0xff] }
 0x14e   :  { %8802 = vmatmul.mubr.msk.f32.gmra.mrb[4].mxu0 %vm95_vm1, %v7269_v8  ;;  %8362 = vmatprep.mubr.msk.f32.mxu1 %vm95_vm1, %v10571_v5  ;;  %v7274_v5 = vld [vmem:[%s12391_s0 + $0xa9] sm:$0xff] }
 0x14f   :  { %8804 = vmatprep.mubr.msk.f32.mxu0 %vm95_vm1, %v7270_v55  ;;  %v7326_v8 = vld [vmem:[%s12391_s0 + $0x349] sm:$0xff] }
 0x150   :  { %v12593_v55 = vld [vmem:[#allocation6_spill] sm:$0xff] }
 0x151   :  { %8363 = vmatmul.mubr.msk.f32.gmra.mrb[38].mxu1 %vm95_vm1, %v10586_v3  ;;  %v7275_v3 = vld [vmem:[%s12391_s0 + $0xb1] sm:$0xff] }
 0x152   :  { %8805 = vmatmul.mubr.msk.f32.gmra.mrb[6].mxu0 %vm95_vm1, %v7271_v4  ;;  %8365 = vmatprep.mubr.msk.f32.mxu1 %vm95_vm1, %v10591_v52  ;;  %v7276_v52 = vld [vmem:[%s12391_s0 + $0xc1] sm:$0xff]  ;;  %v7327_v4 = vld [vmem:[%s12391_s0 + $0x351] sm:$0xff] }
 0x153   :  { %8807 = vmatprep.mubr.msk.f32.mxu0 %vm95_vm1, %v7272_v10  ;;  %v6780_v10 = vld [vmem:[%s12391_s0 + $0x1c8] sm:$0xff] }
 0x155   :  { %8366 = vmatmul.mubr.msk.f32.gmra.mrb[40].mxu1 %vm95_vm1, %v10604_v6  ;;  %v7277_v6 = vld [vmem:[%s12391_s0 + $0xc9] sm:$0xff] }
 0x156   :  { %8808 = vmatmul.mubr.msk.f32.gmra.mrb[8].mxu0 %vm95_vm1, %v7273_v30  ;;  %8368 = vmatprep.mubr.msk.f32.mxu1 %vm95_vm1, %v10609_v9  ;;  %v7278_v9 = vld [vmem:[%s12391_s0 + $0xd9] sm:$0xff] }
 0x157   :  { %8810 = vmatprep.mubr.msk.f32.mxu0 %vm95_vm1, %v7274_v5  ;;  %v7393_v30 = vld [vmem:[%s12391_s0 + $0x32] sm:$0xff]  ;;  %v12594_v5 = vld [vmem:[#allocation66_spill] sm:$0xff] }
 0x159   :  { %8369 = vmatmul.mubr.msk.f32.gmra.mrb[42].mxu1 %vm95_vm1, %v10622_v11  ;;  %v7279_v11 = vld [vmem:[%s12391_s0 + $0xe1] sm:$0xff] }
 0x15a   :  { %8811 = vmatmul.mubr.msk.f32.gmra.mrb[10].mxu0 %vm95_vm1, %v7275_v3  ;;  %8371 = vmatprep.mubr.msk.f32.mxu1 %vm95_vm1, %v10627_v13  ;;  %v7280_v13 = vld [vmem:[%s12391_s0 + $0xf1] sm:$0xff] }
 0x15b   :  { %8813 = vmatprep.mubr.msk.f32.mxu0 %vm95_vm1, %v7276_v52  ;;  %v6781_v3 = vld [vmem:[%s12391_s0 + $0x1d0] sm:$0xff]  ;;  %v7394_v52 = vld [vmem:[%s12391_s0 + $0x3a] sm:$0xff] }
 0x15d   :  { %8372 = vmatmul.mubr.msk.f32.gmra.mrb[44].mxu1 %vm95_vm1, %v10640_v15  ;;  %v7281_v15 = vld [vmem:[%s12391_s0 + $0xf9] sm:$0xff] }
 0x15e   :  { %8814 = vmatmul.mubr.msk.f32.gmra.mrb[12].mxu0 %vm95_vm1, %v7277_v6  ;;  %8374 = vmatprep.mubr.msk.f32.mxu1 %vm95_vm1, %v10645_v17  ;;  %v7282_v17 = vld [vmem:[%s12391_s0 + $0x109] sm:$0xff]  ;;  %v6782_v6 = vld [vmem:[%s12391_s0 + $0x1e0] sm:$0xff] }
 0x15f   :  { %8816 = vmatprep.mubr.msk.f32.mxu0 %vm95_vm1, %v7278_v9  ;;  %v7395_v9 = vld [vmem:[%s12391_s0 + $0x4a] sm:$0xff] }
 0x161   :  { %8375 = vmatmul.mubr.msk.f32.gmra.mrb[46].mxu1 %vm95_vm1, %v10658_v19  ;;  %v7283_v19 = vld [vmem:[%s12391_s0 + $0x111] sm:$0xff] }
 0x162   :  { %8817 = vmatmul.mubr.msk.f32.gmra.mrb[14].mxu0 %vm95_vm1, %v7279_v11  ;;  %8377 = vmatprep.mubr.msk.f32.mxu1 %vm95_vm1, %v10663_v21  ;;  %v7284_v21 = vld [vmem:[%s12391_s0 + $0x121] sm:$0xff] }
 0x163   :  { %8819 = vmatprep.mubr.msk.f32.mxu0 %vm95_vm1, %v7280_v13  ;;  %v6783_v11 = vld [vmem:[%s12391_s0 + $0x1e8] sm:$0xff]  ;;  %v7396_v13 = vld [vmem:[%s12391_s0 + $0x52] sm:$0xff] }
 0x165   :  { %8378 = vmatmul.mubr.msk.f32.gmra.mrb[48].mxu1 %vm95_vm1, %v10676_v23  ;;  %v7285_v23 = vld [vmem:[%s12391_s0 + $0x129] sm:$0xff] }
 0x166   :  { %8820 = vmatmul.mubr.msk.f32.gmra.mrb[16].mxu0 %vm95_vm1, %v7281_v15  ;;  %8380 = vmatprep.mubr.msk.f32.mxu1 %vm95_vm1, %v10681_v25  ;;  %v7286_v25 = vld [vmem:[%s12391_s0 + $0x139] sm:$0xff] }
 0x167   :  { %8822 = vmatprep.mubr.msk.f32.mxu0 %vm95_vm1, %v7282_v17  ;;  %v6784_v15 = vld [vmem:[%s12391_s0 + $0x1f8] sm:$0xff]  ;;  %v7397_v17 = vld [vmem:[%s12391_s0 + $0x62] sm:$0xff] }
 0x169   :  { %8381 = vmatmul.mubr.msk.f32.gmra.mrb[50].mxu1 %vm95_vm1, %v10694_v27  ;;  %v7287_v27 = vld [vmem:[%s12391_s0 + $0x141] sm:$0xff] }
 0x16a   :  { %8823 = vmatmul.mubr.msk.f32.gmra.mrb[18].mxu0 %vm95_vm1, %v7283_v19  ;;  %8383 = vmatprep.mubr.msk.f32.mxu1 %vm95_vm1, %v10699_v29  ;;  %v7288_v29 = vld [vmem:[%s12391_s0 + $0x151] sm:$0xff]  ;;  %v6785_v19 = vld [vmem:[%s12391_s0 + $0x200] sm:$0xff] }
 0x16b   :  { %8825 = vmatprep.mubr.msk.f32.mxu0 %vm95_vm1, %v7284_v21  ;;  %v7398_v21 = vld [vmem:[%s12391_s0 + $0x6a] sm:$0xff] }
 0x16d   :  { %8384 = vmatmul.mubr.msk.f32.gmra.mrb[52].mxu1 %vm95_vm1, %v10712_v32  ;;  %v7289_v32 = vld [vmem:[%s12391_s0 + $0x159] sm:$0xff] }
 0x16e   :  { %8826 = vmatmul.mubr.msk.f32.gmra.mrb[20].mxu0 %vm95_vm1, %v7285_v23  ;;  %8386 = vmatprep.mubr.msk.f32.mxu1 %vm95_vm1, %v10717_v34  ;;  %v7290_v34 = vld [vmem:[%s12391_s0 + $0x169] sm:$0xff] }
 0x16f   :  { %8828 = vmatprep.mubr.msk.f32.mxu0 %vm95_vm1, %v7286_v25  ;;  %v6786_v23 = vld [vmem:[%s12391_s0 + $0x210] sm:$0xff]  ;;  %v7399_v25 = vld [vmem:[%s12391_s0 + $0x7a] sm:$0xff] }
 0x171   :  { %8387 = vmatmul.mubr.msk.f32.gmra.mrb[54].mxu1 %vm95_vm1, %v10730_v36  ;;  %v7291_v36 = vld [vmem:[%s12391_s0 + $0x171] sm:$0xff] }
 0x172   :  { %8829 = vmatmul.mubr.msk.f32.gmra.mrb[22].mxu0 %vm95_vm1, %v7287_v27  ;;  %8389 = vmatprep.mubr.msk.f32.mxu1 %vm95_vm1, %v10735_v38  ;;  %v7292_v38 = vld [vmem:[%s12391_s0 + $0x181] sm:$0xff]  ;;  %v6787_v27 = vld [vmem:[%s12391_s0 + $0x218] sm:$0xff] }
 0x173   :  { %8831 = vmatprep.mubr.msk.f32.mxu0 %vm95_vm1, %v7288_v29  ;;  %v7400_v29 = vld [vmem:[%s12391_s0 + $0x82] sm:$0xff] }
 0x175   :  { %8390 = vmatmul.mubr.msk.f32.gmra.mrb[56].mxu1 %vm95_vm1, %v10748_v40  ;;  %v7293_v40 = vld [vmem:[%s12391_s0 + $0x189] sm:$0xff] }
 0x176   :  { %8832 = vmatmul.mubr.msk.f32.gmra.mrb[24].mxu0 %vm95_vm1, %v7289_v32  ;;  %8392 = vmatprep.mubr.msk.f32.mxu1 %vm95_vm1, %v10753_v42  ;;  %v7294_v42 = vld [vmem:[%s12391_s0 + $0x199] sm:$0xff]  ;;  %v6788_v32 = vld [vmem:[%s12391_s0 + $0x228] sm:$0xff] }
 0x177   :  { %8834 = vmatprep.mubr.msk.f32.mxu0 %vm95_vm1, %v7290_v34  ;;  %v7401_v34 = vld [vmem:[%s12391_s0 + $0x92] sm:$0xff] }
 0x179   :  { %8393 = vmatmul.mubr.msk.f32.gmra.mrb[58].mxu1 %vm95_vm1, %v10766_v44  ;;  %v7295_v44 = vld [vmem:[%s12391_s0 + $0x1a1] sm:$0xff] }
 0x17a   :  { %8835 = vmatmul.mubr.msk.f32.gmra.mrb[26].mxu0 %vm95_vm1, %v7291_v36  ;;  %8395 = vmatprep.mubr.msk.f32.mxu1 %vm95_vm1, %v10771_v46  ;;  %v6748_v46 = vld [vmem:[%s12391_s0 + $0x18] sm:$0xff]  ;;  %v6789_v36 = vld [vmem:[%s12391_s0 + $0x230] sm:$0xff] }
 0x17b   :  { %8837 = vmatprep.mubr.msk.f32.mxu0 %vm95_vm1, %v7292_v38  ;;  %v7402_v38 = vld [vmem:[%s12391_s0 + $0x9a] sm:$0xff] }
 0x17d   :  { %8396 = vmatmul.mubr.msk.f32.gmra.mrb[60].mxu1 %vm95_vm1, %v10784_v48  ;;  %v6749_v48 = vld [vmem:[%s12391_s0 + $0x20] sm:$0xff] }
 0x17e   :  { %8838 = vmatmul.mubr.msk.f32.gmra.mrb[28].mxu0 %vm95_vm1, %v7293_v40  ;;  %8398 = vmatprep.mubr.msk.f32.mxu1 %vm95_vm1, %v10789_v50  ;;  %v6750_v50 = vld [vmem:[%s12391_s0 + $0x30] sm:$0xff]  ;;  %v6790_v40 = vld [vmem:[%s12391_s0 + $0x240] sm:$0xff] }
 0x17f   :  { %8840 = vmatprep.mubr.msk.f32.mxu0 %vm95_vm1, %v7294_v42  ;;  %v7403_v42 = vld [vmem:[%s12391_s0 + $0xaa] sm:$0xff] }
 0x181   :  { %8399 = vmatmul.mubr.msk.f32.gmra.mrb[62].mxu1 %vm95_vm1, %v10802_v53  ;;  %v9570_v53 = vld [vmem:[%s12392_s1 + $0x10] sm:$0xf] }
 0x182   :  { %8841 = vmatmul.mubr.msk.f32.gmra.mrb[30].mxu0 %vm95_vm1, %v7295_v44  ;;  %8403 = vmatprep.mubr.msk.f32.mxu1 %vm95_vm1, %v6748_v46  ;;  %v6791_v44 = vld [vmem:[%s12391_s0 + $0x248] sm:$0xff]  ;;  %v7404_v46 = vld [vmem:[%s12391_s0 + $0xb2] sm:$0xff] }
 0x183   :  { %8843 = vmatprep.mubr.msk.f32.mxu0 %vm95_vm1, %v10851_v12  ;;  %v6752_v12 = vld [vmem:[%s12391_s0 + $0x48] sm:$0xff] }
 0x185   :  { %8404 = vmatmul.mubr.msk.f32.vlgmr.msra.gmra.mrb[0].mxu1 %vm95_vm1, %v6749_v48  ;;  %v6792_v48 = vld [vmem:[%s12391_s0 + $0x258] sm:$0xff] }
 0x186   :  { %8844 = vmatmul.mubr.msk.f32.gmra.mrb[32].mxu0 %vm95_vm1, %v10863_v1  ;;  %8990 = vmatpush3.msk.msra.mxu1 %vm288_vm0, %v9570_v53  ;;  %v6753_v1 = vld [vmem:[%s12391_s0 + $0x50] sm:$0xff]  ;;  %v6793_v53 = vld [vmem:[%s12391_s0 + $0x260] sm:$0xff] }
 0x187   :  { %8406 = vmatprep.mubr.msk.f32.mxu1 %vm95_vm1, %v6750_v50  ;;  %8846 = vmatprep.mubr.msk.f32.mxu0 %vm95_vm1, %v10870_v14  ;;  %v6754_v14 = vld [vmem:[%s12391_s0 + $0x60] sm:$0xff] }
 0x188   :  { %v7405_v50 = vld [vmem:[%s12391_s0 + $0xc2] sm:$0xff] }
 0x189   :  { %8407 = vmatmul.mubr.msk.f32.gmra.mrb[2].mxu1 %vm95_vm1, %v6751_v7  ;;  %v7406_v7 = vld [vmem:[%s12391_s0 + $0xca] sm:$0xff] }
 0x18a   :  { %8847 = vmatmul.mubr.msk.f32.gmra.mrb[34].mxu0 %vm95_vm1, %v10881_v16  ;;  %8409 = vmatprep.mubr.msk.f32.mxu1 %vm95_vm1, %v6752_v12  ;;  %v6755_v16 = vld [vmem:[%s12391_s0 + $0x68] sm:$0xff]  ;;  %v6794_v12 = vld [vmem:[%s12391_s0 + $0x270] sm:$0xff] }
 0x18b   :  { %8849 = vmatprep.mubr.msk.f32.mxu0 %vm95_vm1, %v10888_v18  ;;  %v6756_v18 = vld [vmem:[%s12391_s0 + $0x78] sm:$0xff] }
 0x18d   :  { %8410 = vmatmul.mubr.msk.f32.gmra.mrb[4].mxu1 %vm95_vm1, %v6753_v1  ;;  %v7407_v1 = vld [vmem:[%s12391_s0 + $0xda] sm:$0xff] }
 0x18e   :  { %8850 = vmatmul.mubr.msk.f32.gmra.mrb[36].mxu0 %vm95_vm1, %v10899_v20  ;;  %8412 = vmatprep.mubr.msk.f32.mxu1 %vm95_vm1, %v6754_v14  ;;  %v6757_v20 = vld [vmem:[%s12391_s0 + $0x80] sm:$0xff]  ;;  %v6795_v14 = vld [vmem:[%s12391_s0 + $0x278] sm:$0xff] }
 0x18f   :  { %8852 = vmatprep.mubr.msk.f32.mxu0 %vm95_vm1, %v10906_v22  ;;  %v6758_v22 = vld [vmem:[%s12391_s0 + $0x90] sm:$0xff] }
 0x191   :  { %8413 = vmatmul.mubr.msk.f32.gmra.mrb[6].mxu1 %vm95_vm1, %v6755_v16  ;;  %v7408_v16 = vld [vmem:[%s12391_s0 + $0xe2] sm:$0xff] }
 0x192   :  { %8853 = vmatmul.mubr.msk.f32.gmra.mrb[38].mxu0 %vm95_vm1, %v10917_v24  ;;  %8415 = vmatprep.mubr.msk.f32.mxu1 %vm95_vm1, %v6756_v18  ;;  %v6759_v24 = vld [vmem:[%s12391_s0 + $0x98] sm:$0xff]  ;;  %v6796_v18 = vld [vmem:[%s12391_s0 + $0x288] sm:$0xff] }
 0x193   :  { %8855 = vmatprep.mubr.msk.f32.mxu0 %vm95_vm1, %v10924_v26  ;;  %v6760_v26 = vld [vmem:[%s12391_s0 + $0xa8] sm:$0xff] }
 0x195   :  { %8416 = vmatmul.mubr.msk.f32.gmra.mrb[8].mxu1 %vm95_vm1, %v6757_v20  ;;  %v7409_v20 = vld [vmem:[%s12391_s0 + $0xf2] sm:$0xff] }
 0x196   :  { %8856 = vmatmul.mubr.msk.f32.gmra.mrb[40].mxu0 %vm95_vm1, %v10935_v28  ;;  %8418 = vmatprep.mubr.msk.f32.mxu1 %vm95_vm1, %v6758_v22  ;;  %v6761_v28 = vld [vmem:[%s12391_s0 + $0xb0] sm:$0xff] }
 0x197   :  { %8858 = vmatprep.mubr.msk.f32.mxu0 %vm95_vm1, %v10942_v31  ;;  %v6762_v31 = vld [vmem:[%s12391_s0 + $0xc0] sm:$0xff]  ;;  %v6797_v22 = vld [vmem:[%s12391_s0 + $0x290] sm:$0xff] }
 0x199   :  { %8419 = vmatmul.mubr.msk.f32.gmra.mrb[10].mxu1 %vm95_vm1, %v6759_v24  ;;  %v7410_v24 = vld [vmem:[%s12391_s0 + $0xfa] sm:$0xff] }
 0x19a   :  { %8859 = vmatmul.mubr.msk.f32.gmra.mrb[42].mxu0 %vm95_vm1, %v10953_v33  ;;  %8421 = vmatprep.mubr.msk.f32.mxu1 %vm95_vm1, %v6760_v26  ;;  %v6763_v33 = vld [vmem:[%s12391_s0 + $0xc8] sm:$0xff]  ;;  %v6798_v26 = vld [vmem:[%s12391_s0 + $0x2a0] sm:$0xff] }
 0x19b   :  { %8861 = vmatprep.mubr.msk.f32.mxu0 %vm95_vm1, %v10960_v35  ;;  %v6764_v35 = vld [vmem:[%s12391_s0 + $0xd8] sm:$0xff] }
 0x19d   :  { %8422 = vmatmul.mubr.msk.f32.gmra.mrb[12].mxu1 %vm95_vm1, %v6761_v28  ;;  %v7411_v28 = vld [vmem:[%s12391_s0 + $0x10a] sm:$0xff] }
 0x19e   :  { %8862 = vmatmul.mubr.msk.f32.gmra.mrb[44].mxu0 %vm95_vm1, %v10971_v37  ;;  %8424 = vmatprep.mubr.msk.f32.mxu1 %vm95_vm1, %v6762_v31  ;;  %v6765_v37 = vld [vmem:[%s12391_s0 + $0xe0] sm:$0xff]  ;;  %v6799_v31 = vld [vmem:[%s12391_s0 + $0x2a8] sm:$0xff] }
 0x19f   :  { %8864 = vmatprep.mubr.msk.f32.mxu0 %vm95_vm1, %v10978_v39  ;;  %v6766_v39 = vld [vmem:[%s12391_s0 + $0xf0] sm:$0xff] }
 0x1a1   :  { %8425 = vmatmul.mubr.msk.f32.gmra.mrb[14].mxu1 %vm95_vm1, %v6763_v33  ;;  %v7412_v33 = vld [vmem:[%s12391_s0 + $0x112] sm:$0xff] }
 0x1a2   :  { %8865 = vmatmul.mubr.msk.f32.gmra.mrb[46].mxu0 %vm95_vm1, %v10989_v41  ;;  %8427 = vmatprep.mubr.msk.f32.mxu1 %vm95_vm1, %v6764_v35  ;;  %v6767_v41 = vld [vmem:[%s12391_s0 + $0xf8] sm:$0xff] }
 0x1a3   :  { %8867 = vmatprep.mubr.msk.f32.mxu0 %vm95_vm1, %v10996_v43  ;;  %v6768_v43 = vld [vmem:[%s12391_s0 + $0x108] sm:$0xff]  ;;  %v6800_v35 = vld [vmem:[%s12391_s0 + $0x2b8] sm:$0xff] }
 0x1a5   :  { %8428 = vmatmul.mubr.msk.f32.gmra.mrb[16].mxu1 %vm95_vm1, %v6765_v37  ;;  %v7413_v37 = vld [vmem:[%s12391_s0 + $0x122] sm:$0xff] }
 0x1a6   :  { %8868 = vmatmul.mubr.msk.f32.gmra.mrb[48].mxu0 %vm95_vm1, %v11007_v45  ;;  %8430 = vmatprep.mubr.msk.f32.mxu1 %vm95_vm1, %v6766_v39  ;;  %v6769_v45 = vld [vmem:[%s12391_s0 + $0x110] sm:$0xff]  ;;  %v6801_v39 = vld [vmem:[%s12391_s0 + $0x2c0] sm:$0xff] }
 0x1a7   :  { %8870 = vmatprep.mubr.msk.f32.mxu0 %vm95_vm1, %v11014_v47  ;;  %v6770_v47 = vld [vmem:[%s12391_s0 + $0x120] sm:$0xff] }
 0x1a9   :  { %8431 = vmatmul.mubr.msk.f32.gmra.mrb[18].mxu1 %vm95_vm1, %v6767_v41  ;;  %v7414_v41 = vld [vmem:[%s12391_s0 + $0x12a] sm:$0xff] }
 0x1aa   :  { %8871 = vmatmul.mubr.msk.f32.gmra.mrb[50].mxu0 %vm95_vm1, %v11025_v49  ;;  %8433 = vmatprep.mubr.msk.f32.mxu1 %vm95_vm1, %v6768_v43  ;;  %v6771_v49 = vld [vmem:[%s12391_s0 + $0x128] sm:$0xff]  ;;  %v6802_v43 = vld [vmem:[%s12391_s0 + $0x2d0] sm:$0xff] }
 0x1ab   :  { %8873 = vmatprep.mubr.msk.f32.mxu0 %vm95_vm1, %v11032_v51  ;;  %v6772_v51 = vld [vmem:[%s12391_s0 + $0x138] sm:$0xff] }
 0x1ad   :  { %8434 = vmatmul.mubr.msk.f32.gmra.mrb[20].mxu1 %vm95_vm1, %v6769_v45  ;;  %v7415_v45 = vld [vmem:[%s12391_s0 + $0x13a] sm:$0xff] }
 0x1ae   :  { %8874 = vmatmul.mubr.msk.f32.gmra.mrb[52].mxu0 %vm95_vm1, %v11043_v54  ;;  %8436 = vmatprep.mubr.msk.f32.mxu1 %vm95_vm1, %v6770_v47  ;;  %v6773_v54 = vld [vmem:[%s12391_s0 + $0x140] sm:$0xff]  ;;  %v6803_v47 = vld [vmem:[%s12391_s0 + $0x2d8] sm:$0xff] }
 0x1af   :  { %8876 = vmatprep.mubr.msk.f32.mxu0 %vm95_vm1, %v11050_v56  ;;  %v6774_v56 = vld [vmem:[%s12391_s0 + $0x150] sm:$0xff] }
 0x1b1   :  { %8437 = vmatmul.mubr.msk.f32.gmra.mrb[22].mxu1 %vm95_vm1, %v6771_v49  ;;  %v7416_v49 = vld [vmem:[%s12391_s0 + $0x142] sm:$0xff] }
 0x1b2   :  { %8877 = vmatmul.mubr.msk.f32.gmra.mrb[54].mxu0 %vm95_vm1, %v11061_v58  ;;  %8439 = vmatprep.mubr.msk.f32.mxu1 %vm95_vm1, %v6772_v51  ;;  %v6775_v58 = vld [vmem:[%s12391_s0 + $0x158] sm:$0xff]  ;;  %v6804_v51 = vld [vmem:[%s12391_s0 + $0x2e8] sm:$0xff] }
 0x1b3   :  { %8879 = vmatprep.mubr.msk.f32.mxu0 %vm95_vm1, %v11068_v62  ;;  %v6776_v62 = vld [vmem:[%s12391_s0 + $0x168] sm:$0xff] }
 0x1b5   :  { %8440 = vmatmul.mubr.msk.f32.gmra.mrb[24].mxu1 %vm95_vm1, %v6773_v54  ;;  %v7417_v54 = vld [vmem:[%s12391_s0 + $0x152] sm:$0xff] }
 0x1b6   :  { %8880 = vmatmul.mubr.msk.f32.gmra.mrb[56].mxu0 %vm95_vm1, %v12590_v63  ;;  %8442 = vmatprep.mubr.msk.f32.mxu1 %vm95_vm1, %v6774_v56  ;;  %v6805_v56 = vld [vmem:[%s12391_s0 + $0x2f0] sm:$0xff]  ;;  %v7418_v63 = vld [vmem:[%s12391_s0 + $0x15a] sm:$0xff] }
 0x1b7   :  { %8882 = vmatprep.mubr.msk.f32.mxu0 %vm95_vm1, %v12591_v57  ;;  %v7419_v57 = vld [vmem:[%s12391_s0 + $0x16a] sm:$0xff] }
 0x1b9   :  { %8443 = vmatmul.mubr.msk.f32.gmra.mrb[26].mxu1 %vm95_vm1, %v6775_v58  ;;  %v6806_v58 = vld [vmem:[%s12391_s0 + $0x300] sm:$0xff] }
 0x1ba   :  { %8883 = vmatmul.mubr.msk.f32.gmra.mrb[58].mxu0 %vm95_vm1, %v12592_v0  ;;  %8445 = vmatprep.mubr.msk.f32.mxu1 %vm95_vm1, %v6776_v62  ;;  %v6807_v62 = vld [vmem:[%s12391_s0 + $0x308] sm:$0xff]  ;;  %v7420_v0 = vld [vmem:[%s12391_s0 + $0x172] sm:$0xff] }
 0x1bb   :  { %8885 = vmatprep.mubr.msk.f32.mxu0 %vm95_vm1, %v11642_v60 }
 0x1bd   :  { %8446 = vmatmul.mubr.msk.f32.gmra.mrb[28].mxu1 %vm95_vm1, %v6777_v2  ;;  %v6808_v2 = vld [vmem:[%s12391_s0 + $0x318] sm:$0xff] }
 0x1be   :  { %8886 = vmatmul.mubr.msk.f32.gmra.mrb[60].mxu0 %vm95_vm1, %v11656_v61  ;;  %8448 = vmatprep.mubr.msk.f32.mxu1 %vm95_vm1, %v12593_v55  ;;  %v6809_v55 = vld [vmem:[%s12391_s0 + $0x320] sm:$0xff] }
 0x1bf   :  { %8888 = vmatprep.mubr.msk.f32.mxu0 %vm95_vm1, %v7326_v8  ;;  %v7421_v8 = vld [vmem:[%s12391_s0 + $0x182] sm:$0xff] }
 0x1c1   :  { %8449 = vmatmul.mubr.msk.f32.gmra.mrb[30].mxu1 %vm95_vm1, %v12594_v5  ;;  %v6909_v5 = vld [vmem:[%s12391_s0 + $0x1c9] sm:$0xff] }
 0x1c2   :  { %8889 = vmatmul.mubr.msk.f32.gmra.mrb[62].mxu0 %vm95_vm1, %v7327_v4  ;;  %8451 = vmatprep.mubr.msk.f32.mxu1 %vm95_vm1, %v6780_v10  ;;  %v7422_v4 = vld [vmem:[%s12391_s0 + $0x18a] sm:$0xff]  ;;  %v7423_v10 = vld [vmem:[%s12391_s0 + $0x19a] sm:$0xff] }
 0x1c3   :  { %8893 = vmatprep.mubr.msk.f32.mxu0 %vm95_vm1, %v7393_v30  ;;  %v7424_v30 = vld [vmem:[%s12391_s0 + $0x1a2] sm:$0xff] }
 0x1c5   :  { %8452 = vmatmul.mubr.msk.f32.gmra.mrb[32].mxu1 %vm95_vm1, %v6781_v3  ;;  %v7425_v3 = vld [vmem:[%s12391_s0 + $0x1e2] sm:$0xff] }
 0x1c6   :  { %8894 = vmatmul.mubr.msk.f32.vlgmr.msra.gmra.mrb[0].mxu0 %vm95_vm1, %v7394_v52  ;;  %8454 = vmatprep.mubr.msk.f32.mxu1 %vm95_vm1, %v6782_v6  ;;  %v12595_v52 = vld [vmem:[#allocation12_spill] sm:$0xff]  ;;  %v7426_v6 = vld [vmem:[%s12391_s0 + $0x1ea] sm:$0xff] }
 0x1c7   :  { %8896 = vmatprep.mubr.msk.f32.mxu0 %vm95_vm1, %v7395_v9  ;;  %v6911_v9 = vld [vmem:[%s12391_s0 + $0x1e1] sm:$0xff] }
 0x1c9   :  { %8455 = vmatmul.mubr.msk.f32.gmra.mrb[34].mxu1 %vm95_vm1, %v6783_v11  ;;  %v7427_v11 = vld [vmem:[%s12391_s0 + $0x1fa] sm:$0xff] }
 0x1ca   :  { %8897 = vmatmul.mubr.msk.f32.gmra.mrb[2].mxu0 %vm95_vm1, %v7396_v13  ;;  %8457 = vmatprep.mubr.msk.f32.mxu1 %vm95_vm1, %v6784_v15  ;;  %v6912_v13 = vld [vmem:[%s12391_s0 + $0x1e9] sm:$0xff] }
 0x1cb   :  { %8899 = vmatprep.mubr.msk.f32.mxu0 %vm95_vm1, %v7397_v17  ;;  %v7428_v15 = vld [vmem:[%s12391_s0 + $0x202] sm:$0xff]  ;;  %v6913_v17 = vld [vmem:[%s12391_s0 + $0x1f9] sm:$0xff] }
 0x1cd   :  { %8458 = vmatmul.mubr.msk.f32.gmra.mrb[36].mxu1 %vm95_vm1, %v6785_v19  ;;  %v7429_v19 = vld [vmem:[%s12391_s0 + $0x212] sm:$0xff] }
 0x1ce   :  { %8900 = vmatmul.mubr.msk.f32.gmra.mrb[4].mxu0 %vm95_vm1, %v7398_v21  ;;  %8460 = vmatprep.mubr.msk.f32.mxu1 %vm95_vm1, %v6786_v23  ;;  %v6914_v21 = vld [vmem:[%s12391_s0 + $0x201] sm:$0xff] }
 0x1cf   :  { %8902 = vmatprep.mubr.msk.f32.mxu0 %vm95_vm1, %v7399_v25  ;;  %v7430_v23 = vld [vmem:[%s12391_s0 + $0x21a] sm:$0xff]  ;;  %v6915_v25 = vld [vmem:[%s12391_s0 + $0x211] sm:$0xff] }
 0x1d1   :  { %8461 = vmatmul.mubr.msk.f32.gmra.mrb[38].mxu1 %vm95_vm1, %v6787_v27  ;;  %v7431_v27 = vld [vmem:[%s12391_s0 + $0x22a] sm:$0xff] }
 0x1d2   :  { %8903 = vmatmul.mubr.msk.f32.gmra.mrb[6].mxu0 %vm95_vm1, %v7400_v29  ;;  %8463 = vmatprep.mubr.msk.f32.mxu1 %vm95_vm1, %v6788_v32  ;;  %v6916_v29 = vld [vmem:[%s12391_s0 + $0x219] sm:$0xff] }
 0x1d3   :  { %8905 = vmatprep.mubr.msk.f32.mxu0 %vm95_vm1, %v7401_v34  ;;  %v7432_v32 = vld [vmem:[%s12391_s0 + $0x232] sm:$0xff]  ;;  %v6917_v34 = vld [vmem:[%s12391_s0 + $0x229] sm:$0xff] }
 0x1d5   :  { %8464 = vmatmul.mubr.msk.f32.gmra.mrb[40].mxu1 %vm95_vm1, %v6789_v36  ;;  %v7433_v36 = vld [vmem:[%s12391_s0 + $0x242] sm:$0xff] }
 0x1d6   :  { %8906 = vmatmul.mubr.msk.f32.gmra.mrb[8].mxu0 %vm95_vm1, %v7402_v38  ;;  %8466 = vmatprep.mubr.msk.f32.mxu1 %vm95_vm1, %v6790_v40  ;;  %v6918_v38 = vld [vmem:[%s12391_s0 + $0x231] sm:$0xff] }
 0x1d7   :  { %8908 = vmatprep.mubr.msk.f32.mxu0 %vm95_vm1, %v7403_v42  ;;  %v7434_v40 = vld [vmem:[%s12391_s0 + $0x24a] sm:$0xff]  ;;  %v6919_v42 = vld [vmem:[%s12391_s0 + $0x241] sm:$0xff] }
 0x1d9   :  { %8467 = vmatmul.mubr.msk.f32.gmra.mrb[42].mxu1 %vm95_vm1, %v6791_v44  ;;  %v7435_v44 = vld [vmem:[%s12391_s0 + $0x25a] sm:$0xff] }
 0x1da   :  { %8909 = vmatmul.mubr.msk.f32.gmra.mrb[10].mxu0 %vm95_vm1, %v7404_v46  ;;  %8469 = vmatprep.mubr.msk.f32.mxu1 %vm95_vm1, %v6792_v48  ;;  %v6920_v46 = vld [vmem:[%s12391_s0 + $0x249] sm:$0xff] }
 0x1db   :  { %8911 = vmatprep.mubr.msk.f32.mxu0 %vm95_vm1, %v7405_v50  ;;  %v7436_v48 = vld [vmem:[%s12391_s0 + $0x262] sm:$0xff]  ;;  %v6921_v50 = vld [vmem:[%s12391_s0 + $0x259] sm:$0xff] }
 0x1dd   :  { %8470 = vmatmul.mubr.msk.f32.gmra.mrb[44].mxu1 %vm95_vm1, %v6793_v53  ;;  %v7437_v53 = vld [vmem:[%s12391_s0 + $0x272] sm:$0xff] }
 0x1de   :  { %8912 = vmatmul.mubr.msk.f32.gmra.mrb[12].mxu0 %vm95_vm1, %v7406_v7  ;;  %8472 = vmatprep.mubr.msk.f32.mxu1 %vm95_vm1, %v6794_v12  ;;  %v6922_v7 = vld [vmem:[%s12391_s0 + $0x261] sm:$0xff] }
 0x1df   :  { %8914 = vmatprep.mubr.msk.f32.mxu0 %vm95_vm1, %v7407_v1  ;;  %v7438_v12 = vld [vmem:[%s12391_s0 + $0x27a] sm:$0xff]  ;;  %v6923_v1 = vld [vmem:[%s12391_s0 + $0x271] sm:$0xff] }
 0x1e1   :  { %8473 = vmatmul.mubr.msk.f32.gmra.mrb[46].mxu1 %vm95_vm1, %v6795_v14  ;;  %v7439_v14 = vld [vmem:[%s12391_s0 + $0x28a] sm:$0xff] }
 0x1e2   :  { %8915 = vmatmul.mubr.msk.f32.gmra.mrb[14].mxu0 %vm95_vm1, %v7408_v16  ;;  %8475 = vmatprep.mubr.msk.f32.mxu1 %vm95_vm1, %v6796_v18  ;;  %v6924_v16 = vld [vmem:[%s12391_s0 + $0x279] sm:$0xff] }
 0x1e3   :  { %8917 = vmatprep.mubr.msk.f32.mxu0 %vm95_vm1, %v7409_v20  ;;  %v7440_v18 = vld [vmem:[%s12391_s0 + $0x292] sm:$0xff]  ;;  %v6925_v20 = vld [vmem:[%s12391_s0 + $0x289] sm:$0xff] }
 0x1e5   :  { %8476 = vmatmul.mubr.msk.f32.gmra.mrb[48].mxu1 %vm95_vm1, %v6797_v22  ;;  %v7441_v22 = vld [vmem:[%s12391_s0 + $0x2a2] sm:$0xff] }
 0x1e6   :  { %8918 = vmatmul.mubr.msk.f32.gmra.mrb[16].mxu0 %vm95_vm1, %v7410_v24  ;;  %8478 = vmatprep.mubr.msk.f32.mxu1 %vm95_vm1, %v6798_v26  ;;  %v6926_v24 = vld [vmem:[%s12391_s0 + $0x291] sm:$0xff] }
 0x1e7   :  { %8920 = vmatprep.mubr.msk.f32.mxu0 %vm95_vm1, %v7411_v28  ;;  %v7442_v26 = vld [vmem:[%s12391_s0 + $0x2aa] sm:$0xff]  ;;  %v6927_v28 = vld [vmem:[%s12391_s0 + $0x2a1] sm:$0xff] }
 0x1e9   :  { %8479 = vmatmul.mubr.msk.f32.gmra.mrb[50].mxu1 %vm95_vm1, %v6799_v31  ;;  %v7443_v31 = vld [vmem:[%s12391_s0 + $0x2ba] sm:$0xff] }
 0x1ea   :  { %8921 = vmatmul.mubr.msk.f32.gmra.mrb[18].mxu0 %vm95_vm1, %v7412_v33  ;;  %8481 = vmatprep.mubr.msk.f32.mxu1 %vm95_vm1, %v6800_v35  ;;  %v6928_v33 = vld [vmem:[%s12391_s0 + $0x2a9] sm:$0xff] }
 0x1eb   :  { %8923 = vmatprep.mubr.msk.f32.mxu0 %vm95_vm1, %v7413_v37  ;;  %v7444_v35 = vld [vmem:[%s12391_s0 + $0x2c2] sm:$0xff]  ;;  %v6929_v37 = vld [vmem:[%s12391_s0 + $0x2b9] sm:$0xff] }
 0x1ed   :  { %8482 = vmatmul.mubr.msk.f32.gmra.mrb[52].mxu1 %vm95_vm1, %v6801_v39  ;;  %v7445_v39 = vld [vmem:[%s12391_s0 + $0x2d2] sm:$0xff] }
 0x1ee   :  { %8924 = vmatmul.mubr.msk.f32.gmra.mrb[20].mxu0 %vm95_vm1, %v7414_v41  ;;  %8484 = vmatprep.mubr.msk.f32.mxu1 %vm95_vm1, %v6802_v43  ;;  %v6930_v41 = vld [vmem:[%s12391_s0 + $0x2c1] sm:$0xff] }
 0x1ef   :  { %8926 = vmatprep.mubr.msk.f32.mxu0 %vm95_vm1, %v7415_v45  ;;  %v7446_v43 = vld [vmem:[%s12391_s0 + $0x2da] sm:$0xff]  ;;  %v6931_v45 = vld [vmem:[%s12391_s0 + $0x2d1] sm:$0xff] }
 0x1f1   :  { %8485 = vmatmul.mubr.msk.f32.gmra.mrb[54].mxu1 %vm95_vm1, %v6803_v47  ;;  %v7447_v47 = vld [vmem:[%s12391_s0 + $0x2ea] sm:$0xff] }
 0x1f2   :  { %8927 = vmatmul.mubr.msk.f32.gmra.mrb[22].mxu0 %vm95_vm1, %v7416_v49  ;;  %8487 = vmatprep.mubr.msk.f32.mxu1 %vm95_vm1, %v6804_v51  ;;  %v6932_v49 = vld [vmem:[%s12391_s0 + $0x2d9] sm:$0xff] }
 0x1f3   :  { %8929 = vmatprep.mubr.msk.f32.mxu0 %vm95_vm1, %v7417_v54  ;;  %v7448_v51 = vld [vmem:[%s12391_s0 + $0x2f2] sm:$0xff]  ;;  %v6933_v54 = vld [vmem:[%s12391_s0 + $0x2e9] sm:$0xff] }
 0x1f5   :  { %8488 = vmatmul.mubr.msk.f32.gmra.mrb[56].mxu1 %vm95_vm1, %v6805_v56  ;;  %v7449_v56 = vld [vmem:[%s12391_s0 + $0x302] sm:$0xff] }
 0x1f6   :  { %8930 = vmatmul.mubr.msk.f32.gmra.mrb[24].mxu0 %vm95_vm1, %v7418_v63  ;;  %8490 = vmatprep.mubr.msk.f32.mxu1 %vm95_vm1, %v6806_v58  ;;  %v6934_v63 = vld [vmem:[%s12391_s0 + $0x2f1] sm:$0xff] }
 0x1f7   :  { %8932 = vmatprep.mubr.msk.f32.mxu0 %vm95_vm1, %v7419_v57  ;;  %v7450_v58 = vld [vmem:[%s12391_s0 + $0x30a] sm:$0xff]  ;;  %v6935_v57 = vld [vmem:[%s12391_s0 + $0x301] sm:$0xff] }
 0x1f9   :  { %8491 = vmatmul.mubr.msk.f32.gmra.mrb[58].mxu1 %vm95_vm1, %v6807_v62  ;;  %v7451_v62 = vld [vmem:[%s12391_s0 + $0x31a] sm:$0xff] }
 0x1fa   :  { %8933 = vmatmul.mubr.msk.f32.gmra.mrb[26].mxu0 %vm95_vm1, %v7420_v0  ;;  %8493 = vmatprep.mubr.msk.f32.mxu1 %vm95_vm1, %v6808_v2  ;;  %v6936_v0 = vld [vmem:[%s12391_s0 + $0x309] sm:$0xff] }
 0x1fb   :  { %8935 = vmatprep.mubr.msk.f32.mxu0 %vm95_vm1, %v7421_v8  ;;  %v7452_v2 = vld [vmem:[%s12391_s0 + $0x322] sm:$0xff]  ;;  %v6937_v8 = vld [vmem:[%s12391_s0 + $0x319] sm:$0xff] }
 0x1fd   :  { %8494 = vmatmul.mubr.msk.f32.gmra.mrb[60].mxu1 %vm95_vm1, %v6809_v55  ;;  %v7453_v55 = vld [vmem:[%s12391_s0 + $0x332] sm:$0xff] }
 0x1fe   :  { %8936 = vmatmul.mubr.msk.f32.gmra.mrb[28].mxu0 %vm95_vm1, %v7422_v4  ;;  %8496 = vmatprep.mubr.msk.f32.mxu1 %vm95_vm1, %v11238_v59  ;;  %v6910_v59 = vld [vmem:[%s12391_s0 + $0x1d1] sm:$0xff]  ;;  %v6938_v4 = vld [vmem:[%s12391_s0 + $0x321] sm:$0xff] }
 0x1ff   :  { %8938 = vmatprep.mubr.msk.f32.mxu0 %vm95_vm1, %v7423_v10  ;;  %v7454_v10 = vld [vmem:[%s12391_s0 + $0x33a] sm:$0xff] }
 0x201   :  { %8497 = vmatmul.mubr.msk.f32.gmra.mrb[62].mxu1 %vm95_vm1, %v12595_v52 }
 0x202   :  { %8939 = vmatmul.mubr.msk.f32.gmra.mrb[30].mxu0 %vm95_vm1, %v7424_v30  ;;  %8549 = vmatprep.mubr.msk.f32.mxu1 %vm95_vm1, %v6909_v5  ;;  %v7455_v30 = vld [vmem:[%s12391_s0 + $0x34a] sm:$0xff]  ;;  %v7456_v5 = vld [vmem:[%s12391_s0 + $0x352] sm:$0xff] }
 0x203   :  { %8941 = vmatprep.mubr.msk.f32.mxu0 %vm95_vm1, %v7425_v3 }
 0x205   :  { %8550 = vmatmul.mubr.msk.f32.vlgmr.msra.gmra.mrb[32].mxu1 %vm95_vm1, %v6910_v59 }
 0x206   :  { %8942 = vmatmul.mubr.msk.f32.gmra.mrb[32].mxu0 %vm95_vm1, %v7426_v6  ;;  %8552 = vmatprep.mubr.msk.f32.mxu1 %vm95_vm1, %v6911_v9 }
 0x207   :  { %8944 = vmatprep.mubr.msk.f32.mxu0 %vm95_vm1, %v7427_v11 }
 0x209   :  { %8553 = vmatmul.mubr.msk.f32.gmra.mrb[34].mxu1 %vm95_vm1, %v6912_v13 }
 0x20a   :  { %8945 = vmatmul.mubr.msk.f32.gmra.mrb[34].mxu0 %vm95_vm1, %v7428_v15  ;;  %8555 = vmatprep.mubr.msk.f32.mxu1 %vm95_vm1, %v6913_v17 }
 0x20b   :  { %8947 = vmatprep.mubr.msk.f32.mxu0 %vm95_vm1, %v7429_v19 }
 0x20d   :  { %8556 = vmatmul.mubr.msk.f32.gmra.mrb[36].mxu1 %vm95_vm1, %v6914_v21 }
 0x20e   :  { %8948 = vmatmul.mubr.msk.f32.gmra.mrb[36].mxu0 %vm95_vm1, %v7430_v23  ;;  %8558 = vmatprep.mubr.msk.f32.mxu1 %vm95_vm1, %v6915_v25 }
 0x20f   :  { %8950 = vmatprep.mubr.msk.f32.mxu0 %vm95_vm1, %v7431_v27 }
 0x211   :  { %8559 = vmatmul.mubr.msk.f32.gmra.mrb[38].mxu1 %vm95_vm1, %v6916_v29 }
 0x212   :  { %8951 = vmatmul.mubr.msk.f32.gmra.mrb[38].mxu0 %vm95_vm1, %v7432_v32  ;;  %8561 = vmatprep.mubr.msk.f32.mxu1 %vm95_vm1, %v6917_v34 }
 0x213   :  { %8953 = vmatprep.mubr.msk.f32.mxu0 %vm95_vm1, %v7433_v36 }
 0x215   :  { %8562 = vmatmul.mubr.msk.f32.gmra.mrb[40].mxu1 %vm95_vm1, %v6918_v38 }
 0x216   :  { %8954 = vmatmul.mubr.msk.f32.gmra.mrb[40].mxu0 %vm95_vm1, %v7434_v40  ;;  %8564 = vmatprep.mubr.msk.f32.mxu1 %vm95_vm1, %v6919_v42 }
 0x217   :  { %8956 = vmatprep.mubr.msk.f32.mxu0 %vm95_vm1, %v7435_v44 }
 0x219   :  { %8565 = vmatmul.mubr.msk.f32.gmra.mrb[42].mxu1 %vm95_vm1, %v6920_v46 }
 0x21a   :  { %8957 = vmatmul.mubr.msk.f32.gmra.mrb[42].mxu0 %vm95_vm1, %v7436_v48  ;;  %8567 = vmatprep.mubr.msk.f32.mxu1 %vm95_vm1, %v6921_v50 }
 0x21b   :  { %8959 = vmatprep.mubr.msk.f32.mxu0 %vm95_vm1, %v7437_v53 }
 0x21d   :  { %8568 = vmatmul.mubr.msk.f32.gmra.mrb[44].mxu1 %vm95_vm1, %v6922_v7 }
 0x21e   :  { %8960 = vmatmul.mubr.msk.f32.gmra.mrb[44].mxu0 %vm95_vm1, %v7438_v12  ;;  %8570 = vmatprep.mubr.msk.f32.mxu1 %vm95_vm1, %v6923_v1 }
 0x21f   :  { %8962 = vmatprep.mubr.msk.f32.mxu0 %vm95_vm1, %v7439_v14  ;;  %v12224_v14 = vld [vmem:[%s12393_s2] ss:$0 sm:$0xff]  ;;  %s9595_s2 = smov [#allocation2]  }
 0x220   :  { %s6541_s4 = sshll.u32 %s9595_s2, 4  ;;  %s6542_s4 = int_to_ptr.vmem [resolvable:$true] %s6541_s4 }
 0x221   :  { %8571 = vmatmul.mubr.msk.f32.gmra.mrb[46].mxu1 %vm95_vm1, %v6924_v16  ;;  %s9571_s1 = scalar_lea.vmem %s6542_s4, 8192  ;;  %p9576_p1 = scmp.lt.s32.totalorder %s6542_s4, %s6542_s4 }
 0x222   :  { %8963 = vmatmul.mubr.msk.f32.gmra.mrb[46].mxu0 %vm95_vm1, %v7440_v18  ;;  %8573 = vmatprep.mubr.msk.f32.mxu1 %vm95_vm1, %v6925_v20  ;;  %p9572_p0 = scmp.ne.s32.totalorder %s6542_s4, %s9571_s1  ;;  %p9577_p2 = scmp.lt.s32.totalorder %s9571_s1, %s9571_s1 }
 0x223   :  { %8965 = vmatprep.mubr.msk.f32.mxu0 %vm95_vm1, %v7441_v22 }
 0x224   :  { %p9578_p3 = por %p9577_p2, %p9576_p1 }
 0x225   :  { %8574 = vmatmul.mubr.msk.f32.gmra.mrb[48].mxu1 %vm95_vm1, %v6926_v24 }
 0x226   :  { %8966 = vmatmul.mubr.msk.f32.gmra.mrb[48].mxu0 %vm95_vm1, %v7442_v26  ;;  %8576 = vmatprep.mubr.msk.f32.mxu1 %vm95_vm1, %v6927_v28  ;;  %p9579_p4 = pnand %p9578_p3, %p9572_p0 }
 0x227   :  { %8968 = vmatprep.mubr.msk.f32.mxu0 %vm95_vm1, %v7443_v31 }
 0x229   :  { %8577 = vmatmul.mubr.msk.f32.gmra.mrb[50].mxu1 %vm95_vm1, %v6928_v33 }
 0x22a   :  { %8969 = vmatmul.mubr.msk.f32.gmra.mrb[50].mxu0 %vm95_vm1, %v7444_v35  ;;  %8579 = vmatprep.mubr.msk.f32.mxu1 %vm95_vm1, %v6929_v37 }
 0x22b   :  { %8971 = vmatprep.mubr.msk.f32.mxu0 %vm95_vm1, %v7445_v39 }
 0x22d   :  { %8580 = vmatmul.mubr.msk.f32.gmra.mrb[52].mxu1 %vm95_vm1, %v6930_v41 }
 0x22e   :  { %8972 = vmatmul.mubr.msk.f32.gmra.mrb[52].mxu0 %vm95_vm1, %v7446_v43  ;;  %8582 = vmatprep.mubr.msk.f32.mxu1 %vm95_vm1, %v6931_v45 }
 0x22f   :  { %8974 = vmatprep.mubr.msk.f32.mxu0 %vm95_vm1, %v7447_v47 }
 0x231   :  { %8583 = vmatmul.mubr.msk.f32.gmra.mrb[54].mxu1 %vm95_vm1, %v6932_v49 }
 0x232   :  { %8975 = vmatmul.mubr.msk.f32.gmra.mrb[54].mxu0 %vm95_vm1, %v7448_v51  ;;  %8585 = vmatprep.mubr.msk.f32.mxu1 %vm95_vm1, %v6933_v54 }
 0x233   :  { %8977 = vmatprep.mubr.msk.f32.mxu0 %vm95_vm1, %v7449_v56 }
 0x235   :  { %8586 = vmatmul.mubr.msk.f32.gmra.mrb[56].mxu1 %vm95_vm1, %v6934_v63 }
 0x236   :  { %8978 = vmatmul.mubr.msk.f32.gmra.mrb[56].mxu0 %vm95_vm1, %v7450_v58  ;;  %8588 = vmatprep.mubr.msk.f32.mxu1 %vm95_vm1, %v6935_v57 }
 0x237   :  { %8980 = vmatprep.mubr.msk.f32.mxu0 %vm95_vm1, %v7451_v62 }
 0x239   :  { %8589 = vmatmul.mubr.msk.f32.gmra.mrb[58].mxu1 %vm95_vm1, %v6936_v0 }
 0x23a   :  { %8981 = vmatmul.mubr.msk.f32.gmra.mrb[58].mxu0 %vm95_vm1, %v7452_v2  ;;  %8591 = vmatprep.mubr.msk.f32.mxu1 %vm95_vm1, %v6937_v8 }
 0x23b   :  { %8983 = vmatprep.mubr.msk.f32.mxu0 %vm95_vm1, %v7453_v55 }
 0x23d   :  { %8592 = vmatmul.mubr.msk.f32.gmra.mrb[60].mxu1 %vm95_vm1, %v6938_v4 }
 0x23e   :  { %8984 = vmatmul.mubr.msk.f32.gmra.mrb[60].mxu0 %vm95_vm1, %v7454_v10  ;;  %8594 = vmatprep.mubr.msk.f32.mxu1 %vm95_vm1, %v11642_v60 }
 0x23f   :  { %8986 = vmatprep.mubr.msk.f32.mxu0 %vm95_vm1, %v7455_v30 }
 0x241   :  { %8595 = vmatmul.mubr.msk.f32.gmra.mrb[62].mxu1 %vm95_vm1, %v11656_v61 }
 0x242   :  { %8987 = vmatmul.mubr.msk.f32.gmra.mrb[62].mxu0 %vm95_vm1, %v7456_v5 }
 0x258   :  { %v8405_v3 = vpop.f32.mrb[0].mxu1 }
 0x259   :  { %v2483_v52 = vpop.f32.mrb[1].mxu1  ;;  %v8991_v18 = vadd.f32 %v8405_v3, %v12224_v14 }
 0x25a   :  { %v8993_v20 = vadd.f32 %v12224_v14, %v2483_v52 }
 0x25c   :  { %v8408_v59 = vpop.f32.mrb[2].mxu1 }
 0x25d   :  { %v2493_v6 = vpop.f32.mrb[3].mxu1  ;;  %v8995_v31 = vadd.f32 %v8408_v59, %v12224_v14 }
 0x25e   :  { %v8997_v35 = vadd.f32 %v12224_v14, %v2493_v6 }
 0x260   :  { %v8411_v9 = vpop.f32.mrb[4].mxu1 }
 0x261   :  { %v2503_v11 = vpop.f32.mrb[5].mxu1  ;;  %v8999_v47 = vadd.f32 %v8411_v9, %v12224_v14 }
 0x262   :  { %v9001_v51 = vadd.f32 %v12224_v14, %v2503_v11 }
 0x264   :  { %v8414_v13 = vpop.f32.mrb[6].mxu1 }
 0x265   :  { %v2513_v15 = vpop.f32.mrb[7].mxu1  ;;  %v9003_v62 = vadd.f32 %v8414_v13, %v12224_v14 }
 0x266   :  { %v9005_v2 = vadd.f32 %v12224_v14, %v2513_v15 }
 0x268   :  { %v8417_v60 = vpop.f32.mrb[8].mxu1 }
 0x269   :  { %v12177_v17 = vpop.f32.mrb[9].mxu1  ;;  %v9007_v5 = vadd.f32 %v8417_v60, %v12224_v14 }
 0x26a   :  { %v9009_v52 = vadd.f32 %v12224_v14, %v12177_v17 }
 0x26c   :  { %v12179_v19 = vpop.f32.mrb[10].mxu1 }
 0x26d   :  { %v12181_v21 = vpop.f32.mrb[11].mxu1  ;;  %v9011_v15 = vadd.f32 %v12179_v19, %v12224_v14 }
 0x26e   :  { %v9013_v60 = vadd.f32 %v12224_v14, %v12181_v21 }
 0x270   :  { %v12183_v23 = vpop.f32.mrb[12].mxu1 }
 0x271   :  { %v12185_v61 = vpop.f32.mrb[13].mxu1 }
 0x272   :  { %v9017_v19 = vadd.f32 %v12224_v14, %v12185_v61 }
 0x274   :  { %v12187_v25 = vpop.f32.mrb[14].mxu1 }
 0x275   :  { %v12189_v27 = vpop.f32.mrb[15].mxu1 }
 0x278   :  { %v12191_v29 = vpop.f32.mrb[16].mxu1 }
 0x279   :  { %v12193_v32 = vpop.f32.mrb[17].mxu1 }
 0x27c   :  { %v12195_v34 = vpop.f32.mrb[18].mxu1 }
 0x27d   :  { %v12197_v36 = vpop.f32.mrb[19].mxu1 }
 0x280   :  { %v12199_v38 = vpop.f32.mrb[20].mxu1 }
 0x281   :  { %v12201_v40 = vpop.f32.mrb[21].mxu1 }
 0x284   :  { %v12203_v42 = vpop.f32.mrb[22].mxu1 }
 0x285   :  { %v12205_v44 = vpop.f32.mrb[23].mxu1 }
 0x288   :  { %v12207_v46 = vpop.f32.mrb[24].mxu1 }
 0x289   :  { %v12209_v48 = vpop.f32.mrb[25].mxu1 }
 0x28c   :  { %v12211_v50 = vpop.f32.mrb[26].mxu1 }
 0x28d   :  { %v12213_v53 = vpop.f32.mrb[27].mxu1 }
 0x290   :  { %v12215_v7 = vpop.f32.mrb[28].mxu1 }
 0x291   :  { %v12217_v12 = vpop.f32.mrb[29].mxu1 }
 0x294   :  { %v12219_v1 = vpop.f32.mrb[30].mxu1 }
 0x295   :  { %v12226_v16 = vpop.f32.mrb[31].mxu1 }
 0x299   :  { %v8895_v22 = vpop.f32.mrb[0].mxu0 }
 0x29a   :  { %v8992_v24 = vadd.f32 %v8991_v18, %v8895_v22  ;;  %v6024_v26 = vpop.f32.mrb[1].mxu0 }
 0x29b   :  { %v8994_v28 = vadd.f32 %v8993_v20, %v6024_v26 }
 0x29c   :  { %v6408_v33 = vmax.f32 %v8992_v24, 0.0 }
 0x29d   :  { %v6407_v37 = vmax.f32 %v8994_v28, 0.0  ;;  %v8898_v39 = vpop.f32.mrb[2].mxu0  ;;  %v9015_v28 = vadd.f32 %v12183_v23, %v12224_v14  ;;  %v9021_v23 = vadd.f32 %v12224_v14, %v12189_v27 }
 0x29e   :  { %6473 = vst.msk [vmem:[#allocation2 + $0x8] sm:$0xff] %vm6471_vm2, %v6408_v33  ;;  %v8996_v41 = vadd.f32 %v8995_v31, %v8898_v39  ;;  %v6034_v43 = vpop.f32.mrb[3].mxu0 }
 0x29f   :  { %6472 = vst.msk [vmem:[#allocation2] sm:$0xff] %vm6471_vm2, %v6407_v37  ;;  %v8998_v45 = vadd.f32 %v8997_v35, %v6034_v43 }
 0x2a0   :  { %v6410_v49 = vmax.f32 %v8996_v41, 0.0  ;;  %v9019_v41 = vadd.f32 %v12187_v25, %v12224_v14  ;;  %v9025_v25 = vadd.f32 %v12224_v14, %v12193_v32 }
 0x2a1   :  { %v6409_v54 = vmax.f32 %v8998_v45, 0.0  ;;  %v8901_v56 = vpop.f32.mrb[4].mxu0 }
 0x2a2   :  { %6475 = vst.msk [vmem:[#allocation2 + $0x18] sm:$0xff] %vm6471_vm2, %v6410_v49  ;;  %v9000_v63 = vadd.f32 %v8999_v47, %v8901_v56  ;;  %v6044_v58 = vpop.f32.mrb[5].mxu0 }
 0x2a3   :  { %6474 = vst.msk [vmem:[#allocation2 + $0x10] sm:$0xff] %vm6471_vm2, %v6409_v54  ;;  %v9002_v57 = vadd.f32 %v9001_v51, %v6044_v58  ;;  %v9023_v54 = vadd.f32 %v12191_v29, %v12224_v14  ;;  %v9029_v29 = vadd.f32 %v12224_v14, %v12197_v36 }
 0x2a4   :  { %v6412_v0 = vmax.f32 %v9000_v63, 0.0 }
 0x2a5   :  { %v6411_v8 = vmax.f32 %v9002_v57, 0.0  ;;  %v8904_v55 = vpop.f32.mrb[6].mxu0 }
 0x2a6   :  { %6477 = vst.msk [vmem:[#allocation2 + $0x28] sm:$0xff] %vm6471_vm2, %v6412_v0  ;;  %v9004_v4 = vadd.f32 %v9003_v62, %v8904_v55  ;;  %v6054_v10 = vpop.f32.mrb[7].mxu0  ;;  %v9027_v0 = vadd.f32 %v12195_v34, %v12224_v14  ;;  %v9033_v34 = vadd.f32 %v12224_v14, %v12201_v40 }
 0x2a7   :  { %6476 = vst.msk [vmem:[#allocation2 + $0x20] sm:$0xff] %vm6471_vm2, %v6411_v8  ;;  %v9006_v30 = vadd.f32 %v9005_v2, %v6054_v10 }
 0x2a8   :  { %v6414_v3 = vmax.f32 %v9004_v4, 0.0 }
 0x2a9   :  { %v6413_v59 = vmax.f32 %v9006_v30, 0.0  ;;  %v8907_v6 = vpop.f32.mrb[8].mxu0  ;;  %v9031_v30 = vadd.f32 %v12199_v38, %v12224_v14  ;;  %v9037_v38 = vadd.f32 %v12224_v14, %v12205_v44 }
 0x2aa   :  { %6479 = vst.msk [vmem:[#allocation2 + $0x38] sm:$0xff] %vm6471_vm2, %v6414_v3  ;;  %v9008_v9 = vadd.f32 %v9007_v5, %v8907_v6  ;;  %v6064_v11 = vpop.f32.mrb[9].mxu0 }
 0x2ab   :  { %6478 = vst.msk [vmem:[#allocation2 + $0x30] sm:$0xff] %vm6471_vm2, %v6413_v59  ;;  %v9010_v13 = vadd.f32 %v9009_v52, %v6064_v11 }
 0x2ac   :  { %v6416_v18 = vmax.f32 %v9008_v9, 0.0  ;;  %v9035_v9 = vadd.f32 %v12203_v42, %v12224_v14  ;;  %v9041_v42 = vadd.f32 %v12224_v14, %v12209_v48 }
 0x2ad   :  { %v6415_v20 = vmax.f32 %v9010_v13, 0.0  ;;  %v8910_v22 = vpop.f32.mrb[10].mxu0 }
 0x2ae   :  { %6481 = vst.msk [vmem:[#allocation2 + $0x48] sm:$0xff] %vm6471_vm2, %v6416_v18  ;;  %v9012_v17 = vadd.f32 %v9011_v15, %v8910_v22  ;;  %v6074_v24 = vpop.f32.mrb[11].mxu0 }
 0x2af   :  { %6480 = vst.msk [vmem:[#allocation2 + $0x40] sm:$0xff] %vm6471_vm2, %v6415_v20  ;;  %v9014_v26 = vadd.f32 %v9013_v60, %v6074_v24  ;;  %v9039_v20 = vadd.f32 %v12207_v46, %v12224_v14  ;;  %v9045_v46 = vadd.f32 %v12224_v14, %v12213_v53 }
 0x2b0   :  { %v6418_v31 = vmax.f32 %v9012_v17, 0.0 }
 0x2b1   :  { %v6417_v33 = vmax.f32 %v9014_v26, 0.0  ;;  %v8913_v35 = vpop.f32.mrb[12].mxu0 }
 0x2b2   :  { %6483 = vst.msk [vmem:[#allocation2 + $0x58] sm:$0xff] %vm6471_vm2, %v6418_v31  ;;  %v9016_v21 = vadd.f32 %v9015_v28, %v8913_v35  ;;  %v6084_v37 = vpop.f32.mrb[13].mxu0  ;;  %v9043_v31 = vadd.f32 %v12211_v50, %v12224_v14  ;;  %v9049_v50 = vadd.f32 %v12224_v14, %v12217_v12 }
 0x2b3   :  { %6482 = vst.msk [vmem:[#allocation2 + $0x50] sm:$0xff] %vm6471_vm2, %v6417_v33  ;;  %v9018_v39 = vadd.f32 %v9017_v19, %v6084_v37 }
 0x2b4   :  { %v6420_v43 = vmax.f32 %v9016_v21, 0.0 }
 0x2b5   :  { %v6419_v45 = vmax.f32 %v9018_v39, 0.0  ;;  %v8916_v47 = vpop.f32.mrb[14].mxu0  ;;  %v9047_v39 = vadd.f32 %v12215_v7, %v12224_v14  ;;  %v9053_v7 = vadd.f32 %v12224_v14, %v12226_v16 }
 0x2b6   :  { %6485 = vst.msk [vmem:[#allocation2 + $0x68] sm:$0xff] %vm6471_vm2, %v6420_v43  ;;  %v9020_v61 = vadd.f32 %v9019_v41, %v8916_v47  ;;  %v6094_v49 = vpop.f32.mrb[15].mxu0 }
 0x2b7   :  { %6484 = vst.msk [vmem:[#allocation2 + $0x60] sm:$0xff] %vm6471_vm2, %v6419_v45  ;;  %v9022_v51 = vadd.f32 %v9021_v23, %v6094_v49 }
 0x2b8   :  { %v6422_v56 = vmax.f32 %v9020_v61, 0.0  ;;  %v9051_v61 = vadd.f32 %v12219_v1, %v12224_v14 }
 0x2b9   :  { %v6421_v63 = vmax.f32 %v9022_v51, 0.0  ;;  %v8919_v58 = vpop.f32.mrb[16].mxu0 }
 0x2ba   :  { %6487 = vst.msk [vmem:[#allocation2 + $0x78] sm:$0xff] %vm6471_vm2, %v6422_v56  ;;  %v9024_v27 = vadd.f32 %v9023_v54, %v8919_v58  ;;  %v6104_v57 = vpop.f32.mrb[17].mxu0 }
 0x2bb   :  { %6486 = vst.msk [vmem:[#allocation2 + $0x70] sm:$0xff] %vm6471_vm2, %v6421_v63  ;;  %v9026_v62 = vadd.f32 %v9025_v25, %v6104_v57 }
 0x2bc   :  { %v6424_v2 = vmax.f32 %v9024_v27, 0.0 }
 0x2bd   :  { %v6423_v8 = vmax.f32 %v9026_v62, 0.0  ;;  %v8922_v55 = vpop.f32.mrb[18].mxu0 }
 0x2be   :  { %6489 = vst.msk [vmem:[#allocation2 + $0x88] sm:$0xff] %vm6471_vm2, %v6424_v2  ;;  %v9028_v32 = vadd.f32 %v9027_v0, %v8922_v55  ;;  %v6114_v4 = vpop.f32.mrb[19].mxu0 }
 0x2bf   :  { %6488 = vst.msk [vmem:[#allocation2 + $0x80] sm:$0xff] %vm6471_vm2, %v6423_v8  ;;  %v9030_v10 = vadd.f32 %v9029_v29, %v6114_v4 }
 0x2c0   :  { %v6426_v5 = vmax.f32 %v9028_v32, 0.0 }
 0x2c1   :  { %v6425_v3 = vmax.f32 %v9030_v10, 0.0  ;;  %v8925_v52 = vpop.f32.mrb[20].mxu0 }
 0x2c2   :  { %6491 = vst.msk [vmem:[#allocation2 + $0x98] sm:$0xff] %vm6471_vm2, %v6426_v5  ;;  %v9032_v36 = vadd.f32 %v9031_v30, %v8925_v52  ;;  %v6124_v59 = vpop.f32.mrb[21].mxu0 }
 0x2c3   :  { %6490 = vst.msk [vmem:[#allocation2 + $0x90] sm:$0xff] %vm6471_vm2, %v6425_v3  ;;  %v9034_v6 = vadd.f32 %v9033_v34, %v6124_v59 }
 0x2c4   :  { %v6428_v11 = vmax.f32 %v9032_v36, 0.0 }
 0x2c5   :  { %v6427_v13 = vmax.f32 %v9034_v6, 0.0  ;;  %v8928_v15 = vpop.f32.mrb[22].mxu0 }
 0x2c6   :  { %6493 = vst.msk [vmem:[#allocation2 + $0xa8] sm:$0xff] %vm6471_vm2, %v6428_v11  ;;  %v9036_v40 = vadd.f32 %v9035_v9, %v8928_v15  ;;  %v6134_v18 = vpop.f32.mrb[23].mxu0 }
 0x2c7   :  { %6492 = vst.msk [vmem:[#allocation2 + $0xa0] sm:$0xff] %vm6471_vm2, %v6427_v13  ;;  %v9038_v60 = vadd.f32 %v9037_v38, %v6134_v18 }
 0x2c8   :  { %v6430_v22 = vmax.f32 %v9036_v40, 0.0 }
 0x2c9   :  { %v6429_v17 = vmax.f32 %v9038_v60, 0.0  ;;  %v8931_v24 = vpop.f32.mrb[24].mxu0 }
 0x2ca   :  { %6495 = vst.msk [vmem:[#allocation2 + $0xb8] sm:$0xff] %vm6471_vm2, %v6430_v22  ;;  %v9040_v44 = vadd.f32 %v9039_v20, %v8931_v24  ;;  %v6144_v26 = vpop.f32.mrb[25].mxu0 }
 0x2cb   :  { %6494 = vst.msk [vmem:[#allocation2 + $0xb0] sm:$0xff] %vm6471_vm2, %v6429_v17  ;;  %v9042_v28 = vadd.f32 %v9041_v42, %v6144_v26 }
 0x2cc   :  { %v6432_v19 = vmax.f32 %v9040_v44, 0.0 }
 0x2cd   :  { %v6431_v33 = vmax.f32 %v9042_v28, 0.0  ;;  %v8934_v35 = vpop.f32.mrb[26].mxu0 }
 0x2ce   :  { %6497 = vst.msk [vmem:[#allocation2 + $0xc8] sm:$0xff] %vm6471_vm2, %v6432_v19  ;;  %v9044_v48 = vadd.f32 %v9043_v31, %v8934_v35  ;;  %v6154_v21 = vpop.f32.mrb[27].mxu0 }
 0x2cf   :  { %6496 = vst.msk [vmem:[#allocation2 + $0xc0] sm:$0xff] %vm6471_vm2, %v6431_v33  ;;  %v9046_v37 = vadd.f32 %v9045_v46, %v6154_v21 }
 0x2d0   :  { %v6434_v41 = vmax.f32 %v9044_v48, 0.0 }
 0x2d1   :  { %v6433_v43 = vmax.f32 %v9046_v37, 0.0  ;;  %v8937_v23 = vpop.f32.mrb[28].mxu0 }
 0x2d2   :  { %6499 = vst.msk [vmem:[#allocation2 + $0xd8] sm:$0xff] %vm6471_vm2, %v6434_v41  ;;  %v9048_v53 = vadd.f32 %v9047_v39, %v8937_v23  ;;  %v6164_v45 = vpop.f32.mrb[29].mxu0 }
 0x2d3   :  { %6498 = vst.msk [vmem:[#allocation2 + $0xd0] sm:$0xff] %vm6471_vm2, %v6433_v43  ;;  %v9050_v47 = vadd.f32 %v9049_v50, %v6164_v45 }
 0x2d4   :  { %v6436_v49 = vmax.f32 %v9048_v53, 0.0 }
 0x2d5   :  { %v6435_v51 = vmax.f32 %v9050_v47, 0.0  ;;  %v8940_v54 = vpop.f32.mrb[30].mxu0 }
 0x2d6   :  { %6501 = vst.msk [vmem:[#allocation2 + $0xe8] sm:$0xff] %vm6471_vm2, %v6436_v49  ;;  %v9052_v12 = vadd.f32 %v9051_v61, %v8940_v54  ;;  %v6174_v56 = vpop.f32.mrb[31].mxu0 }
 0x2d7   :  { %6500 = vst.msk [vmem:[#allocation2 + $0xe0] sm:$0xff] %vm6471_vm2, %v6435_v51  ;;  %v9054_v25 = vadd.f32 %v9053_v7, %v6174_v56 }
 0x2d8   :  { %v6438_v63 = vmax.f32 %v9052_v12, 0.0  ;;  %v8551_v58 = vpop.f32.mrb[32].mxu1 }
 0x2d9   :  { %v6437_v27 = vmax.f32 %v9054_v25, 0.0  ;;  %v9055_v57 = vadd.f32 %v8551_v58, %v12224_v14  ;;  %v8943_v62 = vpop.f32.mrb[32].mxu0  ;;  %v3351_v1 = vpop.f32.mrb[33].mxu1 }
 0x2da   :  { %6503 = vst.msk [vmem:[#allocation2 + $0xf8] sm:$0xff] %vm6471_vm2, %v6438_v63  ;;  %v9057_v16 = vadd.f32 %v12224_v14, %v3351_v1  ;;  %v6184_v0 = vpop.f32.mrb[33].mxu0 }
 0x2db   :  { %6502 = vst.msk [vmem:[#allocation2 + $0xf0] sm:$0xff] %vm6471_vm2, %v6437_v27  ;;  %v9056_v2 = vadd.f32 %v9055_v57, %v8943_v62 }
 0x2dc   :  { %v9058_v29 = vadd.f32 %v9057_v16, %v6184_v0  ;;  %v8554_v8 = vpop.f32.mrb[34].mxu1 }
 0x2dd   :  { %v6440_v55 = vmax.f32 %v9056_v2, 0.0  ;;  %v9059_v32 = vadd.f32 %v8554_v8, %v12224_v14  ;;  %v8946_v4 = vpop.f32.mrb[34].mxu0  ;;  %v3361_v10 = vpop.f32.mrb[35].mxu1 }
 0x2de   :  { %v6439_v30 = vmax.f32 %v9058_v29, 0.0  ;;  %v9061_v5 = vadd.f32 %v12224_v14, %v3361_v10  ;;  %v6194_v34 = vpop.f32.mrb[35].mxu0 }
 0x2df   :  { %6505 = vst.msk [vmem:[#allocation2 + $0x108] sm:$0xff] %vm6471_vm2, %v6440_v55  ;;  %v9060_v3 = vadd.f32 %v9059_v32, %v8946_v4 }
 0x2e0   :  { %6504 = vst.msk [vmem:[#allocation2 + $0x100] sm:$0xff] %vm6471_vm2, %v6439_v30  ;;  %v9062_v52 = vadd.f32 %v9061_v5, %v6194_v34  ;;  %v8557_v36 = vpop.f32.mrb[36].mxu1 }
 0x2e1   :  { %v6442_v59 = vmax.f32 %v9060_v3, 0.0  ;;  %v9063_v6 = vadd.f32 %v8557_v36, %v12224_v14  ;;  %v8949_v9 = vpop.f32.mrb[36].mxu0  ;;  %v3371_v11 = vpop.f32.mrb[37].mxu1 }
 0x2e2   :  { %v6441_v38 = vmax.f32 %v9062_v52, 0.0  ;;  %v9065_v13 = vadd.f32 %v12224_v14, %v3371_v11  ;;  %v6204_v15 = vpop.f32.mrb[37].mxu0 }
 0x2e3   :  { %6507 = vst.msk [vmem:[#allocation2 + $0x118] sm:$0xff] %vm6471_vm2, %v6442_v59  ;;  %v9064_v40 = vadd.f32 %v9063_v6, %v8949_v9 }
 0x2e4   :  { %6506 = vst.msk [vmem:[#allocation2 + $0x110] sm:$0xff] %vm6471_vm2, %v6441_v38  ;;  %v9066_v18 = vadd.f32 %v9065_v13, %v6204_v15  ;;  %v8560_v60 = vpop.f32.mrb[38].mxu1 }
 0x2e5   :  { %v6444_v20 = vmax.f32 %v9064_v40, 0.0  ;;  %v9067_v22 = vadd.f32 %v8560_v60, %v12224_v14  ;;  %v8952_v42 = vpop.f32.mrb[38].mxu0  ;;  %v3381_v17 = vpop.f32.mrb[39].mxu1 }
 0x2e6   :  { %v6443_v24 = vmax.f32 %v9066_v18, 0.0  ;;  %v9069_v44 = vadd.f32 %v12224_v14, %v3381_v17  ;;  %v6214_v26 = vpop.f32.mrb[39].mxu0 }
 0x2e7   :  { %6509 = vst.msk [vmem:[#allocation2 + $0x128] sm:$0xff] %vm6471_vm2, %v6444_v20  ;;  %v9068_v28 = vadd.f32 %v9067_v22, %v8952_v42 }
 0x2e8   :  { %6508 = vst.msk [vmem:[#allocation2 + $0x120] sm:$0xff] %vm6471_vm2, %v6443_v24  ;;  %v9070_v31 = vadd.f32 %v9069_v44, %v6214_v26  ;;  %v8563_v19 = vpop.f32.mrb[40].mxu1 }
 0x2e9   :  { %v6446_v46 = vmax.f32 %v9068_v28, 0.0  ;;  %v9071_v33 = vadd.f32 %v8563_v19, %v12224_v14  ;;  %v8955_v35 = vpop.f32.mrb[40].mxu0  ;;  %v3391_v48 = vpop.f32.mrb[41].mxu1 }
 0x2ea   :  { %v6445_v21 = vmax.f32 %v9070_v31, 0.0  ;;  %v9073_v37 = vadd.f32 %v12224_v14, %v3391_v48  ;;  %v6224_v39 = vpop.f32.mrb[41].mxu0 }
 0x2eb   :  { %6511 = vst.msk [vmem:[#allocation2 + $0x138] sm:$0xff] %vm6471_vm2, %v6446_v46  ;;  %v9072_v41 = vadd.f32 %v9071_v33, %v8955_v35 }
 0x2ec   :  { %6510 = vst.msk [vmem:[#allocation2 + $0x130] sm:$0xff] %vm6471_vm2, %v6445_v21  ;;  %v9074_v50 = vadd.f32 %v9073_v37, %v6224_v39  ;;  %v8566_v43 = vpop.f32.mrb[42].mxu1 }
 0x2ed   :  { %v6448_v23 = vmax.f32 %v9072_v41, 0.0  ;;  %v9075_v53 = vadd.f32 %v8566_v43, %v12224_v14  ;;  %v8958_v45 = vpop.f32.mrb[42].mxu0  ;;  %v3401_v47 = vpop.f32.mrb[43].mxu1 }
 0x2ee   :  { %v6447_v61 = vmax.f32 %v9074_v50, 0.0  ;;  %v9077_v49 = vadd.f32 %v12224_v14, %v3401_v47  ;;  %v6234_v7 = vpop.f32.mrb[43].mxu0 }
 0x2ef   :  { %6513 = vst.msk [vmem:[#allocation2 + $0x148] sm:$0xff] %vm6471_vm2, %v6448_v23  ;;  %v9076_v51 = vadd.f32 %v9075_v53, %v8958_v45 }
 0x2f0   :  { %6512 = vst.msk [vmem:[#allocation2 + $0x140] sm:$0xff] %vm6471_vm2, %v6447_v61  ;;  %v9078_v54 = vadd.f32 %v9077_v49, %v6234_v7  ;;  %v8569_v12 = vpop.f32.mrb[44].mxu1 }
 0x2f1   :  { %v6450_v56 = vmax.f32 %v9076_v51, 0.0  ;;  %v9079_v25 = vadd.f32 %v8569_v12, %v12224_v14  ;;  %v8961_v63 = vpop.f32.mrb[44].mxu0  ;;  %v3411_v58 = vpop.f32.mrb[45].mxu1 }
 0x2f2   :  { %v6449_v27 = vmax.f32 %v9078_v54, 0.0  ;;  %v9081_v57 = vadd.f32 %v12224_v14, %v3411_v58  ;;  %v6244_v62 = vpop.f32.mrb[45].mxu0 }
 0x2f3   :  { %6515 = vst.msk [vmem:[#allocation2 + $0x158] sm:$0xff] %vm6471_vm2, %v6450_v56  ;;  %v9080_v1 = vadd.f32 %v9079_v25, %v8961_v63 }
 0x2f4   :  { %6514 = vst.msk [vmem:[#allocation2 + $0x150] sm:$0xff] %vm6471_vm2, %v6449_v27  ;;  %v9082_v16 = vadd.f32 %v9081_v57, %v6244_v62  ;;  %v8572_v0 = vpop.f32.mrb[46].mxu1 }
 0x2f5   :  { %v6452_v2 = vmax.f32 %v9080_v1, 0.0  ;;  %v9083_v29 = vadd.f32 %v8572_v0, %v12224_v14  ;;  %v8964_v8 = vpop.f32.mrb[46].mxu0  ;;  %v3421_v55 = vpop.f32.mrb[47].mxu1 }
 0x2f6   :  { %v6451_v32 = vmax.f32 %v9082_v16, 0.0  ;;  %v9085_v4 = vadd.f32 %v12224_v14, %v3421_v55  ;;  %v6254_v10 = vpop.f32.mrb[47].mxu0 }
 0x2f7   :  { %6517 = vst.msk [vmem:[#allocation2 + $0x168] sm:$0xff] %vm6471_vm2, %v6452_v2  ;;  %v9084_v30 = vadd.f32 %v9083_v29, %v8964_v8 }
 0x2f8   :  { %6516 = vst.msk [vmem:[#allocation2 + $0x160] sm:$0xff] %vm6471_vm2, %v6451_v32  ;;  %v9086_v5 = vadd.f32 %v9085_v4, %v6254_v10  ;;  %v8575_v34 = vpop.f32.mrb[48].mxu1 }
 0x2f9   :  { %v6454_v3 = vmax.f32 %v9084_v30, 0.0  ;;  %v9087_v52 = vadd.f32 %v8575_v34, %v12224_v14  ;;  %v8967_v36 = vpop.f32.mrb[48].mxu0  ;;  %v3431_v59 = vpop.f32.mrb[49].mxu1 }
 0x2fa   :  { %v6453_v6 = vmax.f32 %v9086_v5, 0.0  ;;  %v9089_v9 = vadd.f32 %v12224_v14, %v3431_v59  ;;  %v6264_v11 = vpop.f32.mrb[49].mxu0 }
 0x2fb   :  { %6519 = vst.msk [vmem:[#allocation2 + $0x178] sm:$0xff] %vm6471_vm2, %v6454_v3  ;;  %v9088_v38 = vadd.f32 %v9087_v52, %v8967_v36 }
 0x2fc   :  { %6518 = vst.msk [vmem:[#allocation2 + $0x170] sm:$0xff] %vm6471_vm2, %v6453_v6  ;;  %v9090_v13 = vadd.f32 %v9089_v9, %v6264_v11  ;;  %v8578_v15 = vpop.f32.mrb[50].mxu1 }
 0x2fd   :  { %v6456_v40 = vmax.f32 %v9088_v38, 0.0  ;;  %v9091_v18 = vadd.f32 %v8578_v15, %v12224_v14  ;;  %v8970_v60 = vpop.f32.mrb[50].mxu0  ;;  %v3441_v20 = vpop.f32.mrb[51].mxu1 }
 0x2fe   :  { %v6455_v22 = vmax.f32 %v9090_v13, 0.0  ;;  %v9093_v42 = vadd.f32 %v12224_v14, %v3441_v20  ;;  %v6274_v17 = vpop.f32.mrb[51].mxu0 }
 0x2ff   :  { %6521 = vst.msk [vmem:[#allocation2 + $0x188] sm:$0xff] %vm6471_vm2, %v6456_v40  ;;  %v9092_v24 = vadd.f32 %v9091_v18, %v8970_v60 }
 0x300   :  { %6520 = vst.msk [vmem:[#allocation2 + $0x180] sm:$0xff] %vm6471_vm2, %v6455_v22  ;;  %v9094_v44 = vadd.f32 %v9093_v42, %v6274_v17  ;;  %v8581_v26 = vpop.f32.mrb[52].mxu1 }
 0x301   :  { %v6458_v28 = vmax.f32 %v9092_v24, 0.0  ;;  %v9095_v31 = vadd.f32 %v8581_v26, %v12224_v14  ;;  %v8973_v19 = vpop.f32.mrb[52].mxu0  ;;  %v3451_v46 = vpop.f32.mrb[53].mxu1 }
 0x302   :  { %v6457_v33 = vmax.f32 %v9094_v44, 0.0  ;;  %v9097_v35 = vadd.f32 %v12224_v14, %v3451_v46  ;;  %v6284_v48 = vpop.f32.mrb[53].mxu0 }
 0x303   :  { %6523 = vst.msk [vmem:[#allocation2 + $0x198] sm:$0xff] %vm6471_vm2, %v6458_v28  ;;  %v9096_v21 = vadd.f32 %v9095_v31, %v8973_v19 }
 0x304   :  { %6522 = vst.msk [vmem:[#allocation2 + $0x190] sm:$0xff] %vm6471_vm2, %v6457_v33  ;;  %v9098_v37 = vadd.f32 %v9097_v35, %v6284_v48  ;;  %v8584_v39 = vpop.f32.mrb[54].mxu1 }
 0x305   :  { %v6460_v41 = vmax.f32 %v9096_v21, 0.0  ;;  %v9099_v50 = vadd.f32 %v8584_v39, %v12224_v14  ;;  %v8976_v43 = vpop.f32.mrb[54].mxu0  ;;  %v3461_v23 = vpop.f32.mrb[55].mxu1 }
 0x306   :  { %v6459_v53 = vmax.f32 %v9098_v37, 0.0  ;;  %v9101_v45 = vadd.f32 %v12224_v14, %v3461_v23  ;;  %v6294_v47 = vpop.f32.mrb[55].mxu0 }
 0x307   :  { %6525 = vst.msk [vmem:[#allocation2 + $0x1a8] sm:$0xff] %vm6471_vm2, %v6460_v41  ;;  %v9100_v61 = vadd.f32 %v9099_v50, %v8976_v43 }
 0x308   :  { %6524 = vst.msk [vmem:[#allocation2 + $0x1a0] sm:$0xff] %vm6471_vm2, %v6459_v53  ;;  %v9102_v49 = vadd.f32 %v9101_v45, %v6294_v47  ;;  %v8587_v7 = vpop.f32.mrb[56].mxu1 }
 0x309   :  { %v6462_v51 = vmax.f32 %v9100_v61, 0.0  ;;  %v9103_v54 = vadd.f32 %v8587_v7, %v12224_v14  ;;  %v8979_v12 = vpop.f32.mrb[56].mxu0  ;;  %v3471_v56 = vpop.f32.mrb[57].mxu1 }
 0x30a   :  { %v6461_v25 = vmax.f32 %v9102_v49, 0.0  ;;  %v9105_v63 = vadd.f32 %v12224_v14, %v3471_v56  ;;  %v6304_v58 = vpop.f32.mrb[57].mxu0 }
 0x30b   :  { %6527 = vst.msk [vmem:[#allocation2 + $0x1b8] sm:$0xff] %vm6471_vm2, %v6462_v51  ;;  %v9104_v27 = vadd.f32 %v9103_v54, %v8979_v12 }
 0x30c   :  { %6526 = vst.msk [vmem:[#allocation2 + $0x1b0] sm:$0xff] %vm6471_vm2, %v6461_v25  ;;  %v9106_v57 = vadd.f32 %v9105_v63, %v6304_v58  ;;  %v8590_v62 = vpop.f32.mrb[58].mxu1 }
 0x30d   :  { %v6464_v1 = vmax.f32 %v9104_v27, 0.0  ;;  %v9107_v16 = vadd.f32 %v8590_v62, %v12224_v14  ;;  %v8982_v0 = vpop.f32.mrb[58].mxu0  ;;  %v3481_v2 = vpop.f32.mrb[59].mxu1 }
 0x30e   :  { %v6463_v29 = vmax.f32 %v9106_v57, 0.0  ;;  %v9109_v8 = vadd.f32 %v12224_v14, %v3481_v2  ;;  %v6314_v55 = vpop.f32.mrb[59].mxu0 }
 0x30f   :  { %6529 = vst.msk [vmem:[#allocation2 + $0x1c8] sm:$0xff] %vm6471_vm2, %v6464_v1  ;;  %v9108_v32 = vadd.f32 %v9107_v16, %v8982_v0 }
 0x310   :  { %6528 = vst.msk [vmem:[#allocation2 + $0x1c0] sm:$0xff] %vm6471_vm2, %v6463_v29  ;;  %v9110_v4 = vadd.f32 %v9109_v8, %v6314_v55  ;;  %v8593_v10 = vpop.f32.mrb[60].mxu1 }
 0x311   :  { %v6466_v30 = vmax.f32 %v9108_v32, 0.0  ;;  %v9111_v5 = vadd.f32 %v8593_v10, %v12224_v14  ;;  %v8985_v34 = vpop.f32.mrb[60].mxu0  ;;  %v3491_v3 = vpop.f32.mrb[61].mxu1 }
 0x312   :  { %v6465_v52 = vmax.f32 %v9110_v4, 0.0  ;;  %v9113_v36 = vadd.f32 %v12224_v14, %v3491_v3  ;;  %v6324_v59 = vpop.f32.mrb[61].mxu0 }
 0x313   :  { %6531 = vst.msk [vmem:[#allocation2 + $0x1d8] sm:$0xff] %vm6471_vm2, %v6466_v30  ;;  %v9112_v6 = vadd.f32 %v9111_v5, %v8985_v34 }
 0x314   :  { %6530 = vst.msk [vmem:[#allocation2 + $0x1d0] sm:$0xff] %vm6471_vm2, %v6465_v52  ;;  %v9114_v9 = vadd.f32 %v9113_v36, %v6324_v59  ;;  %v8596_v11 = vpop.f32.mrb[62].mxu1 }
 0x315   :  { %v6468_v38 = vmax.f32 %v9112_v6, 0.0  ;;  %v9115_v13 = vadd.f32 %v8596_v11, %v12224_v14  ;;  %v8988_v15 = vpop.f32.mrb[62].mxu0  ;;  %v3501_v40 = vpop.f32.mrb[63].mxu1 }
 0x316   :  { %v6467_v18 = vmax.f32 %v9114_v9, 0.0  ;;  %v9117_v60 = vadd.f32 %v12224_v14, %v3501_v40  ;;  %v6334_v20 = vpop.f32.mrb[63].mxu0 }
 0x317   :  { %6533 = vst.msk [vmem:[#allocation2 + $0x1e8] sm:$0xff] %vm6471_vm2, %v6468_v38  ;;  %v9116_v22 = vadd.f32 %v9115_v13, %v8988_v15 }
 0x318   :  { %6532 = vst.msk [vmem:[#allocation2 + $0x1e0] sm:$0xff] %vm6471_vm2, %v6467_v18  ;;  %v9118_v42 = vadd.f32 %v9117_v60, %v6334_v20 }
 0x319   :  { %v6470_v17 = vmax.f32 %v9116_v22, 0.0 }
 0x31a   :  { %v6469_v24 = vmax.f32 %v9118_v42, 0.0 }
 0x31b   :  { %6535 = vst.msk [vmem:[#allocation2 + $0x1f8] sm:$0xff] %vm6471_vm2, %v6470_v17 }
 0x31c   :  { %6534 = vst.msk [vmem:[#allocation2 + $0x1f0] sm:$0xff] %vm6471_vm2, %v6469_v24 }
 0x31d   :  { %9582 = shalt.err (!%p9579_p4)
}
 0x31e   :  { %s9583_s7 = scalar_lea.hbm %s12394_s3, 8192 }
 0x31f   :  { %p9584_p5 = scmp.ne.s32.totalorder %s12394_s3, %s9583_s7  ;;  %p9587_p6 = scmp.lt.u32.totalorder %s9583_s7, %s12394_s3 }
 0x321   :  { %p9589_p7 = pnand %p9587_p6, %p9584_p5 }
 0x323   :  { %9592 = shalt.err (!%p9589_p7)
}
 0x324   :  { %s9596_s12 = smov 128   ;;  %s9597_s13 = smov 8  }
 0x325   :  { %6547 = dma.vmem_to_hbm [thread:$0]  %s6542_s4, 8192, %s12394_s3, [#allocation3], %s9596_s12, %s9596_s12, %s9597_s13  }
 0x326   :  { %9593 = dma.done.wait [#allocation3], 8192  }
 0x327   :  { %9594 = vsyncadd [#allocation3], 4294959104 }
 0x328   :  { %6551 = vsyncpa [#allocation3], 1 }

</bundles_post_ra>
